<compile_context>
chip_gen: v7x
topology: tpu7x:2x2x1
jax: 0.10.0
libtpu: 0.0.40
codegen_flags: <defaults>
</compile_context>

<pallas_src>
import functools

import jax
import jax.numpy as jnp
import numpy as np
from jax.experimental import pallas as pl
from jax.experimental.pallas import tpu as pltpu

_SUBLANE = 8  # f32 sublane tile


# ----------------------------------------------------------------------------
# Fused kernel: batched input projection -> unrolled LSTM recurrence ->
#               fc (Linear) -> LogSoftmax.  Single grid step; everything VMEM-resident.
# x_ref is time-major flattened: row (t*B + b) holds x[b, t, :].  B is a multiple of 8.
# ----------------------------------------------------------------------------
def fused_lstm_fc_kernel(len_ref, x_ref, wih_ref, whh_ref, b_ref,
                         fcw_ref, fcb_ref, out_ref, gx_sc, hid_sc,
                         *, B, T, H, pad_token):
    # --- Hoisted input projection for ALL timesteps: one MXU matmul -------------
    gx_sc[...] = (jnp.dot(x_ref[...], wih_ref[...],
                          preferred_element_type=jnp.float32)
                  + b_ref[...])                                  # (T*B, 4H)

    len_col = len_ref[...]                                       # (B, 1) int32
    w_hh = whh_ref[...]                                          # (H, 4H)

    h = jnp.zeros((B, H), jnp.float32)
    c = jnp.zeros((B, H), jnp.float32)

    # --- Fully unrolled recurrence (T is small/static): only h @ W_hh is serial --
    # B is a multiple of 8, so r0 = t*B is a sublane-aligned static offset.
    for t in range(T):
        r0 = t * B
        g = gx_sc[r0:r0 + B, :] + jnp.dot(
            h, w_hh, preferred_element_type=jnp.float32)         # (B, 4H)

        i_g = jax.nn.sigmoid(g[:, 0 * H:1 * H])
        f_g = jax.nn.sigmoid(g[:, 1 * H:2 * H])
        g_g = jnp.tanh(g[:, 2 * H:3 * H])
        o_g = jax.nn.sigmoid(g[:, 3 * H:4 * H])

        c_new = f_g * c + i_g * g_g
        h_new = o_g * jnp.tanh(c_new)

        mask = len_col > t                                       # (B, 1) bool
        c = jnp.where(mask, c_new, c)
        h = jnp.where(mask, h_new, h)
        # Accumulate padded output rows in VMEM scratch (single HBM store later).
        hid_sc[r0:r0 + B, :] = jnp.where(mask, h_new, pad_token)

    # --- Fused classifier on the VMEM-resident hidden states --------------------
    logits = (jnp.dot(hid_sc[...], fcw_ref[...],
                      preferred_element_type=jnp.float32)
              + fcb_ref[...])                                    # (T*B, C)
    m = jnp.max(logits, axis=1, keepdims=True)
    z = logits - m
    lse = jnp.log(jnp.sum(jnp.exp(z), axis=1, keepdims=True))
    out_ref[...] = (z - lse).astype(out_ref.dtype)               # one bulk store


def rnn_forward(x, x_lengths, params, pad_token=0.0):
    """Matches RNN.forward for the LSTM configuration. Returns (B*T, C) log-probs."""
    B, T, D = x.shape
    H = params["w_hh"].shape[0]
    C = params["fc_w"].shape[1]

    # --- Layout plumbing outside the kernel (cheap XLA ops) ----------------------
    # Pad batch to a sublane multiple so every in-kernel row slice is tile-aligned.
    Bp = ((B + _SUBLANE - 1) // _SUBLANE) * _SUBLANE
    lens = x_lengths.reshape(-1).astype(jnp.int32)
    if Bp != B:
        x = jnp.pad(x, ((0, Bp - B), (0, 0), (0, 0)))
        lens = jnp.pad(lens, (0, Bp - B))                        # pad rows: length 0
    # Time-major flatten so per-timestep slices inside the kernel are contiguous.
    x_tm = jnp.transpose(x, (1, 0, 2)).reshape(T * Bp, D)
    len2d = lens.reshape(Bp, 1)

    kernel = functools.partial(fused_lstm_fc_kernel,
                               B=Bp, T=T, H=H, pad_token=pad_token)

    out_tm = pl.pallas_call(
        kernel,
        out_shape=jax.ShapeDtypeStruct((T * Bp, C), jnp.float32),
        grid_spec=pltpu.PrefetchScalarGridSpec(
            num_scalar_prefetch=0,
            grid=(1,),
            in_specs=[
                pl.BlockSpec((Bp, 1), lambda i: (0, 0)),         # lengths
                pl.BlockSpec((T * Bp, D), lambda i: (0, 0)),     # x (time-major flat)
                pl.BlockSpec((D, 4 * H), lambda i: (0, 0)),      # W_ih
                pl.BlockSpec((H, 4 * H), lambda i: (0, 0)),      # W_hh
                pl.BlockSpec((1, 4 * H), lambda i: (0, 0)),      # bias (b_ih + b_hh)
                pl.BlockSpec((H, C), lambda i: (0, 0)),          # fc weight
                pl.BlockSpec((1, C), lambda i: (0, 0)),          # fc bias
            ],
            out_specs=pl.BlockSpec((T * Bp, C), lambda i: (0, 0)),
            scratch_shapes=[
                pltpu.VMEM((T * Bp, 4 * H), jnp.float32),        # hoisted gate pre-acts
                pltpu.VMEM((T * Bp, H), jnp.float32),            # masked hidden outputs
            ],
        ),
        compiler_params=pltpu.CompilerParams(
            dimension_semantics=("arbitrary",)),
    )(len2d, x_tm, params["w_ih"], params["w_hh"], params["b_lstm"],
      params["fc_w"], params["fc_b"])

    # Drop batch padding and reorder time-major rows (t*B + b) back to the PyTorch
    # batch-major flatten (b*T + t).
    out = out_tm.reshape(T, Bp, C)[:, :B, :]
    return out.transpose(1, 0, 2).reshape(B * T, C)


# ----------------------------------------------------------------------------
# Pure-JAX reference for verification
# ----------------------------------------------------------------------------
def rnn_forward_ref(x, x_lengths, params, pad_token=0.0):
    B, T, D = x.shape
    H = params["w_hh"].shape[0]
    w_ih, w_hh, b = params["w_ih"], params["w_hh"], params["b_lstm"][0]

    def step(carry, inp):
        h, c = carry
        x_t, t = inp
        gates = x_t @ w_ih + h @ w_hh + b
        i_g = jax.nn.sigmoid(gates[:, 0 * H:1 * H])
        f_g = jax.nn.sigmoid(gates[:, 1 * H:2 * H])
        g_g = jnp.tanh(gates[:, 2 * H:3 * H])
        o_g = jax.nn.sigmoid(gates[:, 3 * H:4 * H])
        c_new = f_g * c + i_g * g_g
        h_new = o_g * jnp.tanh(c_new)
        mask = (t < x_lengths)[:, None]
        h = jnp.where(mask, h_new, h)
        c = jnp.where(mask, c_new, c)
        out = jnp.where(mask, h_new, pad_token)
        return (h, c), out

    h0 = jnp.zeros((B, H), jnp.float32)
    c0 = jnp.zeros((B, H), jnp.float32)
    _, outs = jax.lax.scan(step, (h0, c0),
                           (jnp.swapaxes(x, 0, 1), jnp.arange(T)))
    rnn_out = jnp.swapaxes(outs, 0, 1).reshape(B * T, H)
    logits = rnn_out @ params["fc_w"] + params["fc_b"][0]
    return jax.nn.log_softmax(logits, axis=1)


if __name__ == "__main__":
    # hparams: input_dim=16, hidden_dim=32, n_layers=1, output_dim=8,
    #          cell_type='LSTM', bidirectional=False, drop_prob=0.0, pad_token=0.0
    B, T, D, H, C = 4, 8, 16, 32, 8
    pad_token = 0.0

    key = jax.random.PRNGKey(0)
    kx, k1, k2, k3, k4, k5 = jax.random.split(key, 6)

    x = jax.random.normal(kx, (B, T, D), dtype=jnp.float32)
    x_lengths = jnp.array([5, 8, 3, 7], dtype=jnp.int32)   # unsorted (enforce_sorted=False)

    s = 1.0 / np.sqrt(H)
    params = {
        # LSTM weights stored transposed relative to PyTorch: (D, 4H) / (H, 4H),
        # gate order (i, f, g, o); bias is b_ih + b_hh combined.
        "w_ih": jax.random.uniform(k1, (D, 4 * H), jnp.float32, -s, s),
        "w_hh": jax.random.uniform(k2, (H, 4 * H), jnp.float32, -s, s),
        "b_lstm": jax.random.uniform(k3, (1, 4 * H), jnp.float32, -s, s),
        # fc: Linear(hidden_out_dim=H, output_dim=C), stored as (H, C)
        "fc_w": jax.random.uniform(k4, (H, C), jnp.float32, -s, s),
        "fc_b": jax.random.uniform(k5, (1, C), jnp.float32, -s, s),
    }

    out = rnn_forward(x, x_lengths, params, pad_token=pad_token)
    out = jax.block_until_ready(out)

    ref = rnn_forward_ref(x, x_lengths, params, pad_token=pad_token)
    np.testing.assert_allclose(np.asarray(out), np.asarray(ref),
                               rtol=1e-4, atol=1e-4)

    assert out.shape == (B * T, C)
    print("KERNEL_OK")
</pallas_src>

<mosaic_0001>
module attributes {stable_mosaic.version = 11 : i64} {
  func.func @fused_lstm_fc_kernel(%arg0: i32, %arg1: memref<8x1xi32, #tpu.memory_space<vmem>>, %arg2: memref<64x16xf32, #tpu.memory_space<vmem>>, %arg3: memref<16x128xf32, #tpu.memory_space<vmem>>, %arg4: memref<32x128xf32, #tpu.memory_space<vmem>>, %arg5: memref<1x128xf32, #tpu.memory_space<vmem>>, %arg6: memref<32x8xf32, #tpu.memory_space<vmem>>, %arg7: memref<1x8xf32, #tpu.memory_space<vmem>>, %arg8: memref<64x8xf32, #tpu.memory_space<vmem>>, %arg9: memref<64x128xf32, #tpu.memory_space<vmem>>, %arg10: memref<64x32xf32, #tpu.memory_space<vmem>>) attributes {dimension_semantics = [#tpu.dimension_semantics<arbitrary>], iteration_bounds = array<i64: 1>, scalar_prefetch = 0 : i64, scratch_operands = 2 : i64, tpu.core_type = #tpu.core_type<tc>, window_params = [{pipeline_mode = #tpu.pipeline_mode<synchronous>, transform_indices = @transform_0, window_bounds = array<i64: 8, 1>}, {pipeline_mode = #tpu.pipeline_mode<synchronous>, transform_indices = @transform_1, window_bounds = array<i64: 64, 16>}, {pipeline_mode = #tpu.pipeline_mode<synchronous>, transform_indices = @transform_2, window_bounds = array<i64: 16, 128>}, {pipeline_mode = #tpu.pipeline_mode<synchronous>, transform_indices = @transform_3, window_bounds = array<i64: 32, 128>}, {pipeline_mode = #tpu.pipeline_mode<synchronous>, transform_indices = @transform_4, window_bounds = array<i64: 1, 128>}, {pipeline_mode = #tpu.pipeline_mode<synchronous>, transform_indices = @transform_5, window_bounds = array<i64: 32, 8>}, {pipeline_mode = #tpu.pipeline_mode<synchronous>, transform_indices = @transform_6, window_bounds = array<i64: 1, 8>}, {pipeline_mode = #tpu.pipeline_mode<synchronous>, transform_indices = @transform_7, window_bounds = array<i64: 64, 8>}]} {
    %c0 = arith.constant 0 : index
    %c0_0 = arith.constant 0 : index
    %0 = vector.load %arg2[%c0, %c0_0] : memref<64x16xf32, #tpu.memory_space<vmem>>, vector<64x16xf32>
    %c0_1 = arith.constant 0 : index
    %c0_2 = arith.constant 0 : index
    %1 = vector.load %arg3[%c0_1, %c0_2] : memref<16x128xf32, #tpu.memory_space<vmem>>, vector<16x128xf32>
    %cst = arith.constant dense<0.000000e+00> : vector<64x128xf32>
    %2 = tpu.matmul %0, %1, %cst {dimension_numbers = #tpu.dot_dimension_numbers<[1], [0], [0], [1], [0, 0, 1, 1], [], []>} : vector<64x16xf32>, vector<16x128xf32>, vector<64x128xf32> -> vector<64x128xf32>
    %c0_3 = arith.constant 0 : index
    %c0_4 = arith.constant 0 : index
    %3 = vector.load %arg5[%c0_3, %c0_4] : memref<1x128xf32, #tpu.memory_space<vmem>>, vector<1x128xf32>
    %4 = vector.broadcast %3 : vector<1x128xf32> to vector<64x128xf32>
    %5 = arith.addf %2, %4 : vector<64x128xf32>
    %c0_5 = arith.constant 0 : index
    %c0_6 = arith.constant 0 : index
    %6 = vector.load %arg9[%c0_5, %c0_6] : memref<64x128xf32, #tpu.memory_space<vmem>>, vector<64x128xf32>
    tpu.vector_store %arg9[%c0_5, %c0_6], %5 {strides = array<i32>} : memref<64x128xf32, #tpu.memory_space<vmem>>, vector<64x128xf32>,
    %c0_7 = arith.constant 0 : index
    %c0_8 = arith.constant 0 : index
    %7 = vector.load %arg1[%c0_7, %c0_8] : memref<8x1xi32, #tpu.memory_space<vmem>>, vector<8x1xi32>
    %c0_9 = arith.constant 0 : index
    %c0_10 = arith.constant 0 : index
    %8 = vector.load %arg4[%c0_9, %c0_10] : memref<32x128xf32, #tpu.memory_space<vmem>>, vector<32x128xf32>
    %cst_11 = arith.constant 0.000000e+00 : f32
    %9 = vector.broadcast %cst_11 : f32 to vector<8x32xf32>
    %cst_12 = arith.constant 0.000000e+00 : f32
    %10 = vector.broadcast %cst_12 : f32 to vector<8x32xf32>
    %c0_13 = arith.constant 0 : index
    %c0_14 = arith.constant 0 : index
    %11 = vector.load %arg9[%c0_13, %c0_14] : memref<64x128xf32, #tpu.memory_space<vmem>>, vector<8x128xf32>
    %cst_15 = arith.constant dense<0.000000e+00> : vector<8x128xf32>
    %12 = tpu.matmul %9, %8, %cst_15 {dimension_numbers = #tpu.dot_dimension_numbers<[1], [0], [0], [1], [0, 0, 1, 1], [], []>} : vector<8x32xf32>, vector<32x128xf32>, vector<8x128xf32> -> vector<8x128xf32>
    %13 = arith.addf %11, %12 : vector<8x128xf32>
    %14 = vector.extract_strided_slice %13 {offsets = [0, 0], sizes = [8, 32], strides = [1, 1]} : vector<8x128xf32> to vector<8x32xf32>
    %15 = arith.negf %14 : vector<8x32xf32>
    %16 = math.exp %15 : vector<8x32xf32>
    %cst_16 = arith.constant 1.000000e+00 : f32
    %17 = vector.broadcast %cst_16 : f32 to vector<8x32xf32>
    %18 = arith.addf %17, %16 : vector<8x32xf32>
    %19 = arith.divf %17, %18 : vector<8x32xf32>
    %20 = vector.extract_strided_slice %13 {offsets = [0, 32], sizes = [8, 32], strides = [1, 1]} : vector<8x128xf32> to vector<8x32xf32>
    %21 = arith.negf %20 : vector<8x32xf32>
    %22 = math.exp %21 : vector<8x32xf32>
    %cst_17 = arith.constant 1.000000e+00 : f32
    %23 = vector.broadcast %cst_17 : f32 to vector<8x32xf32>
    %24 = arith.addf %23, %22 : vector<8x32xf32>
    %25 = arith.divf %23, %24 : vector<8x32xf32>
    %26 = vector.extract_strided_slice %13 {offsets = [0, 64], sizes = [8, 32], strides = [1, 1]} : vector<8x128xf32> to vector<8x32xf32>
    %27 = math.tanh %26 : vector<8x32xf32>
    %28 = vector.extract_strided_slice %13 {offsets = [0, 96], sizes = [8, 32], strides = [1, 1]} : vector<8x128xf32> to vector<8x32xf32>
    %29 = arith.negf %28 : vector<8x32xf32>
    %30 = math.exp %29 : vector<8x32xf32>
    %cst_18 = arith.constant 1.000000e+00 : f32
    %31 = vector.broadcast %cst_18 : f32 to vector<8x32xf32>
    %32 = arith.addf %31, %30 : vector<8x32xf32>
    %33 = arith.divf %31, %32 : vector<8x32xf32>
    %34 = arith.mulf %25, %10 : vector<8x32xf32>
    %35 = arith.mulf %19, %27 : vector<8x32xf32>
    %36 = arith.addf %34, %35 : vector<8x32xf32>
    %37 = math.tanh %36 : vector<8x32xf32>
    %38 = arith.mulf %33, %37 : vector<8x32xf32>
    %c0_i32 = arith.constant 0 : i32
    %39 = vector.broadcast %c0_i32 : i32 to vector<8x1xi32>
    %40 = arith.cmpi sgt, %7, %39 : vector<8x1xi32>
    %41 = vector.shape_cast %40 : vector<8x1xi1> to vector<8x1xi1>
    %42 = vector.broadcast %41 : vector<8x1xi1> to vector<8x32xi1>
    %43 = arith.select %42, %36, %10 : vector<8x32xi1>, vector<8x32xf32>
    %44 = vector.shape_cast %40 : vector<8x1xi1> to vector<8x1xi1>
    %45 = vector.broadcast %44 : vector<8x1xi1> to vector<8x32xi1>
    %46 = arith.select %45, %38, %9 : vector<8x32xi1>, vector<8x32xf32>
    %cst_19 = arith.constant 0.000000e+00 : f32
    %47 = vector.shape_cast %40 : vector<8x1xi1> to vector<8x1xi1>
    %48 = vector.broadcast %47 : vector<8x1xi1> to vector<8x32xi1>
    %49 = vector.broadcast %cst_19 : f32 to vector<8x32xf32>
    %50 = arith.select %48, %38, %49 : vector<8x32xi1>, vector<8x32xf32>
    %c0_20 = arith.constant 0 : index
    %c0_21 = arith.constant 0 : index
    %51 = vector.load %arg10[%c0_20, %c0_21] : memref<64x32xf32, #tpu.memory_space<vmem>>, vector<8x32xf32>
    tpu.vector_store %arg10[%c0_20, %c0_21], %50 {strides = array<i32>} : memref<64x32xf32, #tpu.memory_space<vmem>>, vector<8x32xf32>,
    %c8 = arith.constant 8 : index
    %c0_22 = arith.constant 0 : index
    %52 = vector.load %arg9[%c8, %c0_22] : memref<64x128xf32, #tpu.memory_space<vmem>>, vector<8x128xf32>
    %cst_23 = arith.constant dense<0.000000e+00> : vector<8x128xf32>
    %53 = tpu.matmul %46, %8, %cst_23 {dimension_numbers = #tpu.dot_dimension_numbers<[1], [0], [0], [1], [0, 0, 1, 1], [], []>} : vector<8x32xf32>, vector<32x128xf32>, vector<8x128xf32> -> vector<8x128xf32>
    %54 = arith.addf %52, %53 : vector<8x128xf32>
    %55 = vector.extract_strided_slice %54 {offsets = [0, 0], sizes = [8, 32], strides = [1, 1]} : vector<8x128xf32> to vector<8x32xf32>
    %56 = arith.negf %55 : vector<8x32xf32>
    %57 = math.exp %56 : vector<8x32xf32>
    %cst_24 = arith.constant 1.000000e+00 : f32
    %58 = vector.broadcast %cst_24 : f32 to vector<8x32xf32>
    %59 = arith.addf %58, %57 : vector<8x32xf32>
    %60 = arith.divf %58, %59 : vector<8x32xf32>
    %61 = vector.extract_strided_slice %54 {offsets = [0, 32], sizes = [8, 32], strides = [1, 1]} : vector<8x128xf32> to vector<8x32xf32>
    %62 = arith.negf %61 : vector<8x32xf32>
    %63 = math.exp %62 : vector<8x32xf32>
    %cst_25 = arith.constant 1.000000e+00 : f32
    %64 = vector.broadcast %cst_25 : f32 to vector<8x32xf32>
    %65 = arith.addf %64, %63 : vector<8x32xf32>
    %66 = arith.divf %64, %65 : vector<8x32xf32>
    %67 = vector.extract_strided_slice %54 {offsets = [0, 64], sizes = [8, 32], strides = [1, 1]} : vector<8x128xf32> to vector<8x32xf32>
    %68 = math.tanh %67 : vector<8x32xf32>
    %69 = vector.extract_strided_slice %54 {offsets = [0, 96], sizes = [8, 32], strides = [1, 1]} : vector<8x128xf32> to vector<8x32xf32>
    %70 = arith.negf %69 : vector<8x32xf32>
    %71 = math.exp %70 : vector<8x32xf32>
    %cst_26 = arith.constant 1.000000e+00 : f32
    %72 = vector.broadcast %cst_26 : f32 to vector<8x32xf32>
    %73 = arith.addf %72, %71 : vector<8x32xf32>
    %74 = arith.divf %72, %73 : vector<8x32xf32>
    %75 = arith.mulf %66, %43 : vector<8x32xf32>
    %76 = arith.mulf %60, %68 : vector<8x32xf32>
    %77 = arith.addf %75, %76 : vector<8x32xf32>
    %78 = math.tanh %77 : vector<8x32xf32>
    %79 = arith.mulf %74, %78 : vector<8x32xf32>
    %c1_i32 = arith.constant 1 : i32
    %80 = vector.broadcast %c1_i32 : i32 to vector<8x1xi32>
    %81 = arith.cmpi sgt, %7, %80 : vector<8x1xi32>
    %82 = vector.shape_cast %81 : vector<8x1xi1> to vector<8x1xi1>
    %83 = vector.broadcast %82 : vector<8x1xi1> to vector<8x32xi1>
    %84 = arith.select %83, %77, %43 : vector<8x32xi1>, vector<8x32xf32>
    %85 = vector.shape_cast %81 : vector<8x1xi1> to vector<8x1xi1>
    %86 = vector.broadcast %85 : vector<8x1xi1> to vector<8x32xi1>
    %87 = arith.select %86, %79, %46 : vector<8x32xi1>, vector<8x32xf32>
    %cst_27 = arith.constant 0.000000e+00 : f32
    %88 = vector.shape_cast %81 : vector<8x1xi1> to vector<8x1xi1>
    %89 = vector.broadcast %88 : vector<8x1xi1> to vector<8x32xi1>
    %90 = vector.broadcast %cst_27 : f32 to vector<8x32xf32>
    %91 = arith.select %89, %79, %90 : vector<8x32xi1>, vector<8x32xf32>
    %c8_28 = arith.constant 8 : index
    %c0_29 = arith.constant 0 : index
    %92 = vector.load %arg10[%c8_28, %c0_29] : memref<64x32xf32, #tpu.memory_space<vmem>>, vector<8x32xf32>
    tpu.vector_store %arg10[%c8_28, %c0_29], %91 {strides = array<i32>} : memref<64x32xf32, #tpu.memory_space<vmem>>, vector<8x32xf32>,
    %c16 = arith.constant 16 : index
    %c0_30 = arith.constant 0 : index
    %93 = vector.load %arg9[%c16, %c0_30] : memref<64x128xf32, #tpu.memory_space<vmem>>, vector<8x128xf32>
    %cst_31 = arith.constant dense<0.000000e+00> : vector<8x128xf32>
    %94 = tpu.matmul %87, %8, %cst_31 {dimension_numbers = #tpu.dot_dimension_numbers<[1], [0], [0], [1], [0, 0, 1, 1], [], []>} : vector<8x32xf32>, vector<32x128xf32>, vector<8x128xf32> -> vector<8x128xf32>
    %95 = arith.addf %93, %94 : vector<8x128xf32>
    %96 = vector.extract_strided_slice %95 {offsets = [0, 0], sizes = [8, 32], strides = [1, 1]} : vector<8x128xf32> to vector<8x32xf32>
    %97 = arith.negf %96 : vector<8x32xf32>
    %98 = math.exp %97 : vector<8x32xf32>
    %cst_32 = arith.constant 1.000000e+00 : f32
    %99 = vector.broadcast %cst_32 : f32 to vector<8x32xf32>
    %100 = arith.addf %99, %98 : vector<8x32xf32>
    %101 = arith.divf %99, %100 : vector<8x32xf32>
    %102 = vector.extract_strided_slice %95 {offsets = [0, 32], sizes = [8, 32], strides = [1, 1]} : vector<8x128xf32> to vector<8x32xf32>
    %103 = arith.negf %102 : vector<8x32xf32>
    %104 = math.exp %103 : vector<8x32xf32>
    %cst_33 = arith.constant 1.000000e+00 : f32
    %105 = vector.broadcast %cst_33 : f32 to vector<8x32xf32>
    %106 = arith.addf %105, %104 : vector<8x32xf32>
    %107 = arith.divf %105, %106 : vector<8x32xf32>
    %108 = vector.extract_strided_slice %95 {offsets = [0, 64], sizes = [8, 32], strides = [1, 1]} : vector<8x128xf32> to vector<8x32xf32>
    %109 = math.tanh %108 : vector<8x32xf32>
    %110 = vector.extract_strided_slice %95 {offsets = [0, 96], sizes = [8, 32], strides = [1, 1]} : vector<8x128xf32> to vector<8x32xf32>
    %111 = arith.negf %110 : vector<8x32xf32>
    %112 = math.exp %111 : vector<8x32xf32>
    %cst_34 = arith.constant 1.000000e+00 : f32
    %113 = vector.broadcast %cst_34 : f32 to vector<8x32xf32>
    %114 = arith.addf %113, %112 : vector<8x32xf32>
    %115 = arith.divf %113, %114 : vector<8x32xf32>
    %116 = arith.mulf %107, %84 : vector<8x32xf32>
    %117 = arith.mulf %101, %109 : vector<8x32xf32>
    %118 = arith.addf %116, %117 : vector<8x32xf32>
    %119 = math.tanh %118 : vector<8x32xf32>
    %120 = arith.mulf %115, %119 : vector<8x32xf32>
    %c2_i32 = arith.constant 2 : i32
    %121 = vector.broadcast %c2_i32 : i32 to vector<8x1xi32>
    %122 = arith.cmpi sgt, %7, %121 : vector<8x1xi32>
    %123 = vector.shape_cast %122 : vector<8x1xi1> to vector<8x1xi1>
    %124 = vector.broadcast %123 : vector<8x1xi1> to vector<8x32xi1>
    %125 = arith.select %124, %118, %84 : vector<8x32xi1>, vector<8x32xf32>
    %126 = vector.shape_cast %122 : vector<8x1xi1> to vector<8x1xi1>
    %127 = vector.broadcast %126 : vector<8x1xi1> to vector<8x32xi1>
    %128 = arith.select %127, %120, %87 : vector<8x32xi1>, vector<8x32xf32>
    %cst_35 = arith.constant 0.000000e+00 : f32
    %129 = vector.shape_cast %122 : vector<8x1xi1> to vector<8x1xi1>
    %130 = vector.broadcast %129 : vector<8x1xi1> to vector<8x32xi1>
    %131 = vector.broadcast %cst_35 : f32 to vector<8x32xf32>
    %132 = arith.select %130, %120, %131 : vector<8x32xi1>, vector<8x32xf32>
    %c16_36 = arith.constant 16 : index
    %c0_37 = arith.constant 0 : index
    %133 = vector.load %arg10[%c16_36, %c0_37] : memref<64x32xf32, #tpu.memory_space<vmem>>, vector<8x32xf32>
    tpu.vector_store %arg10[%c16_36, %c0_37], %132 {strides = array<i32>} : memref<64x32xf32, #tpu.memory_space<vmem>>, vector<8x32xf32>,
    %c24 = arith.constant 24 : index
    %c0_38 = arith.constant 0 : index
    %134 = vector.load %arg9[%c24, %c0_38] : memref<64x128xf32, #tpu.memory_space<vmem>>, vector<8x128xf32>
    %cst_39 = arith.constant dense<0.000000e+00> : vector<8x128xf32>
    %135 = tpu.matmul %128, %8, %cst_39 {dimension_numbers = #tpu.dot_dimension_numbers<[1], [0], [0], [1], [0, 0, 1, 1], [], []>} : vector<8x32xf32>, vector<32x128xf32>, vector<8x128xf32> -> vector<8x128xf32>
    %136 = arith.addf %134, %135 : vector<8x128xf32>
    %137 = vector.extract_strided_slice %136 {offsets = [0, 0], sizes = [8, 32], strides = [1, 1]} : vector<8x128xf32> to vector<8x32xf32>
    %138 = arith.negf %137 : vector<8x32xf32>
    %139 = math.exp %138 : vector<8x32xf32>
    %cst_40 = arith.constant 1.000000e+00 : f32
    %140 = vector.broadcast %cst_40 : f32 to vector<8x32xf32>
    %141 = arith.addf %140, %139 : vector<8x32xf32>
    %142 = arith.divf %140, %141 : vector<8x32xf32>
    %143 = vector.extract_strided_slice %136 {offsets = [0, 32], sizes = [8, 32], strides = [1, 1]} : vector<8x128xf32> to vector<8x32xf32>
    %144 = arith.negf %143 : vector<8x32xf32>
    %145 = math.exp %144 : vector<8x32xf32>
    %cst_41 = arith.constant 1.000000e+00 : f32
    %146 = vector.broadcast %cst_41 : f32 to vector<8x32xf32>
    %147 = arith.addf %146, %145 : vector<8x32xf32>
    %148 = arith.divf %146, %147 : vector<8x32xf32>
    %149 = vector.extract_strided_slice %136 {offsets = [0, 64], sizes = [8, 32], strides = [1, 1]} : vector<8x128xf32> to vector<8x32xf32>
    %150 = math.tanh %149 : vector<8x32xf32>
    %151 = vector.extract_strided_slice %136 {offsets = [0, 96], sizes = [8, 32], strides = [1, 1]} : vector<8x128xf32> to vector<8x32xf32>
    %152 = arith.negf %151 : vector<8x32xf32>
    %153 = math.exp %152 : vector<8x32xf32>
    %cst_42 = arith.constant 1.000000e+00 : f32
    %154 = vector.broadcast %cst_42 : f32 to vector<8x32xf32>
    %155 = arith.addf %154, %153 : vector<8x32xf32>
    %156 = arith.divf %154, %155 : vector<8x32xf32>
    %157 = arith.mulf %148, %125 : vector<8x32xf32>
    %158 = arith.mulf %142, %150 : vector<8x32xf32>
    %159 = arith.addf %157, %158 : vector<8x32xf32>
    %160 = math.tanh %159 : vector<8x32xf32>
    %161 = arith.mulf %156, %160 : vector<8x32xf32>
    %c3_i32 = arith.constant 3 : i32
    %162 = vector.broadcast %c3_i32 : i32 to vector<8x1xi32>
    %163 = arith.cmpi sgt, %7, %162 : vector<8x1xi32>
    %164 = vector.shape_cast %163 : vector<8x1xi1> to vector<8x1xi1>
    %165 = vector.broadcast %164 : vector<8x1xi1> to vector<8x32xi1>
    %166 = arith.select %165, %159, %125 : vector<8x32xi1>, vector<8x32xf32>
    %167 = vector.shape_cast %163 : vector<8x1xi1> to vector<8x1xi1>
    %168 = vector.broadcast %167 : vector<8x1xi1> to vector<8x32xi1>
    %169 = arith.select %168, %161, %128 : vector<8x32xi1>, vector<8x32xf32>
    %cst_43 = arith.constant 0.000000e+00 : f32
    %170 = vector.shape_cast %163 : vector<8x1xi1> to vector<8x1xi1>
    %171 = vector.broadcast %170 : vector<8x1xi1> to vector<8x32xi1>
    %172 = vector.broadcast %cst_43 : f32 to vector<8x32xf32>
    %173 = arith.select %171, %161, %172 : vector<8x32xi1>, vector<8x32xf32>
    %c24_44 = arith.constant 24 : index
    %c0_45 = arith.constant 0 : index
    %174 = vector.load %arg10[%c24_44, %c0_45] : memref<64x32xf32, #tpu.memory_space<vmem>>, vector<8x32xf32>
    tpu.vector_store %arg10[%c24_44, %c0_45], %173 {strides = array<i32>} : memref<64x32xf32, #tpu.memory_space<vmem>>, vector<8x32xf32>,
    %c32 = arith.constant 32 : index
    %c0_46 = arith.constant 0 : index
    %175 = vector.load %arg9[%c32, %c0_46] : memref<64x128xf32, #tpu.memory_space<vmem>>, vector<8x128xf32>
    %cst_47 = arith.constant dense<0.000000e+00> : vector<8x128xf32>
    %176 = tpu.matmul %169, %8, %cst_47 {dimension_numbers = #tpu.dot_dimension_numbers<[1], [0], [0], [1], [0, 0, 1, 1], [], []>} : vector<8x32xf32>, vector<32x128xf32>, vector<8x128xf32> -> vector<8x128xf32>
    %177 = arith.addf %175, %176 : vector<8x128xf32>
    %178 = vector.extract_strided_slice %177 {offsets = [0, 0], sizes = [8, 32], strides = [1, 1]} : vector<8x128xf32> to vector<8x32xf32>
    %179 = arith.negf %178 : vector<8x32xf32>
    %180 = math.exp %179 : vector<8x32xf32>
    %cst_48 = arith.constant 1.000000e+00 : f32
    %181 = vector.broadcast %cst_48 : f32 to vector<8x32xf32>
    %182 = arith.addf %181, %180 : vector<8x32xf32>
    %183 = arith.divf %181, %182 : vector<8x32xf32>
    %184 = vector.extract_strided_slice %177 {offsets = [0, 32], sizes = [8, 32], strides = [1, 1]} : vector<8x128xf32> to vector<8x32xf32>
    %185 = arith.negf %184 : vector<8x32xf32>
    %186 = math.exp %185 : vector<8x32xf32>
    %cst_49 = arith.constant 1.000000e+00 : f32
    %187 = vector.broadcast %cst_49 : f32 to vector<8x32xf32>
    %188 = arith.addf %187, %186 : vector<8x32xf32>
    %189 = arith.divf %187, %188 : vector<8x32xf32>
    %190 = vector.extract_strided_slice %177 {offsets = [0, 64], sizes = [8, 32], strides = [1, 1]} : vector<8x128xf32> to vector<8x32xf32>
    %191 = math.tanh %190 : vector<8x32xf32>
    %192 = vector.extract_strided_slice %177 {offsets = [0, 96], sizes = [8, 32], strides = [1, 1]} : vector<8x128xf32> to vector<8x32xf32>
    %193 = arith.negf %192 : vector<8x32xf32>
    %194 = math.exp %193 : vector<8x32xf32>
    %cst_50 = arith.constant 1.000000e+00 : f32
    %195 = vector.broadcast %cst_50 : f32 to vector<8x32xf32>
    %196 = arith.addf %195, %194 : vector<8x32xf32>
    %197 = arith.divf %195, %196 : vector<8x32xf32>
    %198 = arith.mulf %189, %166 : vector<8x32xf32>
    %199 = arith.mulf %183, %191 : vector<8x32xf32>
    %200 = arith.addf %198, %199 : vector<8x32xf32>
    %201 = math.tanh %200 : vector<8x32xf32>
    %202 = arith.mulf %197, %201 : vector<8x32xf32>
    %c4_i32 = arith.constant 4 : i32
    %203 = vector.broadcast %c4_i32 : i32 to vector<8x1xi32>
    %204 = arith.cmpi sgt, %7, %203 : vector<8x1xi32>
    %205 = vector.shape_cast %204 : vector<8x1xi1> to vector<8x1xi1>
    %206 = vector.broadcast %205 : vector<8x1xi1> to vector<8x32xi1>
    %207 = arith.select %206, %200, %166 : vector<8x32xi1>, vector<8x32xf32>
    %208 = vector.shape_cast %204 : vector<8x1xi1> to vector<8x1xi1>
    %209 = vector.broadcast %208 : vector<8x1xi1> to vector<8x32xi1>
    %210 = arith.select %209, %202, %169 : vector<8x32xi1>, vector<8x32xf32>
    %cst_51 = arith.constant 0.000000e+00 : f32
    %211 = vector.shape_cast %204 : vector<8x1xi1> to vector<8x1xi1>
    %212 = vector.broadcast %211 : vector<8x1xi1> to vector<8x32xi1>
    %213 = vector.broadcast %cst_51 : f32 to vector<8x32xf32>
    %214 = arith.select %212, %202, %213 : vector<8x32xi1>, vector<8x32xf32>
    %c32_52 = arith.constant 32 : index
    %c0_53 = arith.constant 0 : index
    %215 = vector.load %arg10[%c32_52, %c0_53] : memref<64x32xf32, #tpu.memory_space<vmem>>, vector<8x32xf32>
    tpu.vector_store %arg10[%c32_52, %c0_53], %214 {strides = array<i32>} : memref<64x32xf32, #tpu.memory_space<vmem>>, vector<8x32xf32>,
    %c40 = arith.constant 40 : index
    %c0_54 = arith.constant 0 : index
    %216 = vector.load %arg9[%c40, %c0_54] : memref<64x128xf32, #tpu.memory_space<vmem>>, vector<8x128xf32>
    %cst_55 = arith.constant dense<0.000000e+00> : vector<8x128xf32>
    %217 = tpu.matmul %210, %8, %cst_55 {dimension_numbers = #tpu.dot_dimension_numbers<[1], [0], [0], [1], [0, 0, 1, 1], [], []>} : vector<8x32xf32>, vector<32x128xf32>, vector<8x128xf32> -> vector<8x128xf32>
    %218 = arith.addf %216, %217 : vector<8x128xf32>
    %219 = vector.extract_strided_slice %218 {offsets = [0, 0], sizes = [8, 32], strides = [1, 1]} : vector<8x128xf32> to vector<8x32xf32>
    %220 = arith.negf %219 : vector<8x32xf32>
    %221 = math.exp %220 : vector<8x32xf32>
    %cst_56 = arith.constant 1.000000e+00 : f32
    %222 = vector.broadcast %cst_56 : f32 to vector<8x32xf32>
    %223 = arith.addf %222, %221 : vector<8x32xf32>
    %224 = arith.divf %222, %223 : vector<8x32xf32>
    %225 = vector.extract_strided_slice %218 {offsets = [0, 32], sizes = [8, 32], strides = [1, 1]} : vector<8x128xf32> to vector<8x32xf32>
    %226 = arith.negf %225 : vector<8x32xf32>
    %227 = math.exp %226 : vector<8x32xf32>
    %cst_57 = arith.constant 1.000000e+00 : f32
    %228 = vector.broadcast %cst_57 : f32 to vector<8x32xf32>
    %229 = arith.addf %228, %227 : vector<8x32xf32>
    %230 = arith.divf %228, %229 : vector<8x32xf32>
    %231 = vector.extract_strided_slice %218 {offsets = [0, 64], sizes = [8, 32], strides = [1, 1]} : vector<8x128xf32> to vector<8x32xf32>
    %232 = math.tanh %231 : vector<8x32xf32>
    %233 = vector.extract_strided_slice %218 {offsets = [0, 96], sizes = [8, 32], strides = [1, 1]} : vector<8x128xf32> to vector<8x32xf32>
    %234 = arith.negf %233 : vector<8x32xf32>
    %235 = math.exp %234 : vector<8x32xf32>
    %cst_58 = arith.constant 1.000000e+00 : f32
    %236 = vector.broadcast %cst_58 : f32 to vector<8x32xf32>
    %237 = arith.addf %236, %235 : vector<8x32xf32>
    %238 = arith.divf %236, %237 : vector<8x32xf32>
    %239 = arith.mulf %230, %207 : vector<8x32xf32>
    %240 = arith.mulf %224, %232 : vector<8x32xf32>
    %241 = arith.addf %239, %240 : vector<8x32xf32>
    %242 = math.tanh %241 : vector<8x32xf32>
    %243 = arith.mulf %238, %242 : vector<8x32xf32>
    %c5_i32 = arith.constant 5 : i32
    %244 = vector.broadcast %c5_i32 : i32 to vector<8x1xi32>
    %245 = arith.cmpi sgt, %7, %244 : vector<8x1xi32>
    %246 = vector.shape_cast %245 : vector<8x1xi1> to vector<8x1xi1>
    %247 = vector.broadcast %246 : vector<8x1xi1> to vector<8x32xi1>
    %248 = arith.select %247, %241, %207 : vector<8x32xi1>, vector<8x32xf32>
    %249 = vector.shape_cast %245 : vector<8x1xi1> to vector<8x1xi1>
    %250 = vector.broadcast %249 : vector<8x1xi1> to vector<8x32xi1>
    %251 = arith.select %250, %243, %210 : vector<8x32xi1>, vector<8x32xf32>
    %cst_59 = arith.constant 0.000000e+00 : f32
    %252 = vector.shape_cast %245 : vector<8x1xi1> to vector<8x1xi1>
    %253 = vector.broadcast %252 : vector<8x1xi1> to vector<8x32xi1>
    %254 = vector.broadcast %cst_59 : f32 to vector<8x32xf32>
    %255 = arith.select %253, %243, %254 : vector<8x32xi1>, vector<8x32xf32>
    %c40_60 = arith.constant 40 : index
    %c0_61 = arith.constant 0 : index
    %256 = vector.load %arg10[%c40_60, %c0_61] : memref<64x32xf32, #tpu.memory_space<vmem>>, vector<8x32xf32>
    tpu.vector_store %arg10[%c40_60, %c0_61], %255 {strides = array<i32>} : memref<64x32xf32, #tpu.memory_space<vmem>>, vector<8x32xf32>,
    %c48 = arith.constant 48 : index
    %c0_62 = arith.constant 0 : index
    %257 = vector.load %arg9[%c48, %c0_62] : memref<64x128xf32, #tpu.memory_space<vmem>>, vector<8x128xf32>
    %cst_63 = arith.constant dense<0.000000e+00> : vector<8x128xf32>
    %258 = tpu.matmul %251, %8, %cst_63 {dimension_numbers = #tpu.dot_dimension_numbers<[1], [0], [0], [1], [0, 0, 1, 1], [], []>} : vector<8x32xf32>, vector<32x128xf32>, vector<8x128xf32> -> vector<8x128xf32>
    %259 = arith.addf %257, %258 : vector<8x128xf32>
    %260 = vector.extract_strided_slice %259 {offsets = [0, 0], sizes = [8, 32], strides = [1, 1]} : vector<8x128xf32> to vector<8x32xf32>
    %261 = arith.negf %260 : vector<8x32xf32>
    %262 = math.exp %261 : vector<8x32xf32>
    %cst_64 = arith.constant 1.000000e+00 : f32
    %263 = vector.broadcast %cst_64 : f32 to vector<8x32xf32>
    %264 = arith.addf %263, %262 : vector<8x32xf32>
    %265 = arith.divf %263, %264 : vector<8x32xf32>
    %266 = vector.extract_strided_slice %259 {offsets = [0, 32], sizes = [8, 32], strides = [1, 1]} : vector<8x128xf32> to vector<8x32xf32>
    %267 = arith.negf %266 : vector<8x32xf32>
    %268 = math.exp %267 : vector<8x32xf32>
    %cst_65 = arith.constant 1.000000e+00 : f32
    %269 = vector.broadcast %cst_65 : f32 to vector<8x32xf32>
    %270 = arith.addf %269, %268 : vector<8x32xf32>
    %271 = arith.divf %269, %270 : vector<8x32xf32>
    %272 = vector.extract_strided_slice %259 {offsets = [0, 64], sizes = [8, 32], strides = [1, 1]} : vector<8x128xf32> to vector<8x32xf32>
    %273 = math.tanh %272 : vector<8x32xf32>
    %274 = vector.extract_strided_slice %259 {offsets = [0, 96], sizes = [8, 32], strides = [1, 1]} : vector<8x128xf32> to vector<8x32xf32>
    %275 = arith.negf %274 : vector<8x32xf32>
    %276 = math.exp %275 : vector<8x32xf32>
    %cst_66 = arith.constant 1.000000e+00 : f32
    %277 = vector.broadcast %cst_66 : f32 to vector<8x32xf32>
    %278 = arith.addf %277, %276 : vector<8x32xf32>
    %279 = arith.divf %277, %278 : vector<8x32xf32>
    %280 = arith.mulf %271, %248 : vector<8x32xf32>
    %281 = arith.mulf %265, %273 : vector<8x32xf32>
    %282 = arith.addf %280, %281 : vector<8x32xf32>
    %283 = math.tanh %282 : vector<8x32xf32>
    %284 = arith.mulf %279, %283 : vector<8x32xf32>
    %c6_i32 = arith.constant 6 : i32
    %285 = vector.broadcast %c6_i32 : i32 to vector<8x1xi32>
    %286 = arith.cmpi sgt, %7, %285 : vector<8x1xi32>
    %287 = vector.shape_cast %286 : vector<8x1xi1> to vector<8x1xi1>
    %288 = vector.broadcast %287 : vector<8x1xi1> to vector<8x32xi1>
    %289 = arith.select %288, %282, %248 : vector<8x32xi1>, vector<8x32xf32>
    %290 = vector.shape_cast %286 : vector<8x1xi1> to vector<8x1xi1>
    %291 = vector.broadcast %290 : vector<8x1xi1> to vector<8x32xi1>
    %292 = arith.select %291, %284, %251 : vector<8x32xi1>, vector<8x32xf32>
    %cst_67 = arith.constant 0.000000e+00 : f32
    %293 = vector.shape_cast %286 : vector<8x1xi1> to vector<8x1xi1>
    %294 = vector.broadcast %293 : vector<8x1xi1> to vector<8x32xi1>
    %295 = vector.broadcast %cst_67 : f32 to vector<8x32xf32>
    %296 = arith.select %294, %284, %295 : vector<8x32xi1>, vector<8x32xf32>
    %c48_68 = arith.constant 48 : index
    %c0_69 = arith.constant 0 : index
    %297 = vector.load %arg10[%c48_68, %c0_69] : memref<64x32xf32, #tpu.memory_space<vmem>>, vector<8x32xf32>
    tpu.vector_store %arg10[%c48_68, %c0_69], %296 {strides = array<i32>} : memref<64x32xf32, #tpu.memory_space<vmem>>, vector<8x32xf32>,
    %c56 = arith.constant 56 : index
    %c0_70 = arith.constant 0 : index
    %298 = vector.load %arg9[%c56, %c0_70] : memref<64x128xf32, #tpu.memory_space<vmem>>, vector<8x128xf32>
    %cst_71 = arith.constant dense<0.000000e+00> : vector<8x128xf32>
    %299 = tpu.matmul %292, %8, %cst_71 {dimension_numbers = #tpu.dot_dimension_numbers<[1], [0], [0], [1], [0, 0, 1, 1], [], []>} : vector<8x32xf32>, vector<32x128xf32>, vector<8x128xf32> -> vector<8x128xf32>
    %300 = arith.addf %298, %299 : vector<8x128xf32>
    %301 = vector.extract_strided_slice %300 {offsets = [0, 0], sizes = [8, 32], strides = [1, 1]} : vector<8x128xf32> to vector<8x32xf32>
    %302 = arith.negf %301 : vector<8x32xf32>
    %303 = math.exp %302 : vector<8x32xf32>
    %cst_72 = arith.constant 1.000000e+00 : f32
    %304 = vector.broadcast %cst_72 : f32 to vector<8x32xf32>
    %305 = arith.addf %304, %303 : vector<8x32xf32>
    %306 = arith.divf %304, %305 : vector<8x32xf32>
    %307 = vector.extract_strided_slice %300 {offsets = [0, 32], sizes = [8, 32], strides = [1, 1]} : vector<8x128xf32> to vector<8x32xf32>
    %308 = arith.negf %307 : vector<8x32xf32>
    %309 = math.exp %308 : vector<8x32xf32>
    %cst_73 = arith.constant 1.000000e+00 : f32
    %310 = vector.broadcast %cst_73 : f32 to vector<8x32xf32>
    %311 = arith.addf %310, %309 : vector<8x32xf32>
    %312 = arith.divf %310, %311 : vector<8x32xf32>
    %313 = vector.extract_strided_slice %300 {offsets = [0, 64], sizes = [8, 32], strides = [1, 1]} : vector<8x128xf32> to vector<8x32xf32>
    %314 = math.tanh %313 : vector<8x32xf32>
    %315 = vector.extract_strided_slice %300 {offsets = [0, 96], sizes = [8, 32], strides = [1, 1]} : vector<8x128xf32> to vector<8x32xf32>
    %316 = arith.negf %315 : vector<8x32xf32>
    %317 = math.exp %316 : vector<8x32xf32>
    %cst_74 = arith.constant 1.000000e+00 : f32
    %318 = vector.broadcast %cst_74 : f32 to vector<8x32xf32>
    %319 = arith.addf %318, %317 : vector<8x32xf32>
    %320 = arith.divf %318, %319 : vector<8x32xf32>
    %321 = arith.mulf %312, %289 : vector<8x32xf32>
    %322 = arith.mulf %306, %314 : vector<8x32xf32>
    %323 = arith.addf %321, %322 : vector<8x32xf32>
    %324 = math.tanh %323 : vector<8x32xf32>
    %325 = arith.mulf %320, %324 : vector<8x32xf32>
    %c7_i32 = arith.constant 7 : i32
    %326 = vector.broadcast %c7_i32 : i32 to vector<8x1xi32>
    %327 = arith.cmpi sgt, %7, %326 : vector<8x1xi32>
    %cst_75 = arith.constant 0.000000e+00 : f32
    %328 = vector.shape_cast %327 : vector<8x1xi1> to vector<8x1xi1>
    %329 = vector.broadcast %328 : vector<8x1xi1> to vector<8x32xi1>
    %330 = vector.broadcast %cst_75 : f32 to vector<8x32xf32>
    %331 = arith.select %329, %325, %330 : vector<8x32xi1>, vector<8x32xf32>
    %c56_76 = arith.constant 56 : index
    %c0_77 = arith.constant 0 : index
    %332 = vector.load %arg10[%c56_76, %c0_77] : memref<64x32xf32, #tpu.memory_space<vmem>>, vector<8x32xf32>
    tpu.vector_store %arg10[%c56_76, %c0_77], %331 {strides = array<i32>} : memref<64x32xf32, #tpu.memory_space<vmem>>, vector<8x32xf32>,
    %c0_78 = arith.constant 0 : index
    %c0_79 = arith.constant 0 : index
    %333 = vector.load %arg10[%c0_78, %c0_79] : memref<64x32xf32, #tpu.memory_space<vmem>>, vector<64x32xf32>
    %c0_80 = arith.constant 0 : index
    %c0_81 = arith.constant 0 : index
    %334 = vector.load %arg6[%c0_80, %c0_81] : memref<32x8xf32, #tpu.memory_space<vmem>>, vector<32x8xf32>
    %cst_82 = arith.constant dense<0.000000e+00> : vector<64x8xf32>
    %335 = tpu.matmul %333, %334, %cst_82 {dimension_numbers = #tpu.dot_dimension_numbers<[1], [0], [0], [1], [0, 0, 1, 1], [], []>} : vector<64x32xf32>, vector<32x8xf32>, vector<64x8xf32> -> vector<64x8xf32>
    %c0_83 = arith.constant 0 : index
    %c0_84 = arith.constant 0 : index
    %336 = vector.load %arg7[%c0_83, %c0_84] : memref<1x8xf32, #tpu.memory_space<vmem>>, vector<1x8xf32>
    %337 = vector.broadcast %336 : vector<1x8xf32> to vector<64x8xf32>
    %338 = arith.addf %335, %337 : vector<64x8xf32>
    %cst_85 = arith.constant dense<0xFF800000> : vector<64xf32>
    %339 = vector.multi_reduction <maximumf>, %338, %cst_85 [1] : vector<64x8xf32> to vector<64xf32>
    %340 = vector.shape_cast %339 : vector<64xf32> to vector<64x1xf32>
    %341 = vector.broadcast %340 : vector<64x1xf32> to vector<64x8xf32>
    %342 = arith.subf %338, %341 : vector<64x8xf32>
    %343 = math.exp %342 : vector<64x8xf32>
    %cst_86 = arith.constant dense<0.000000e+00> : vector<64xf32>
    %344 = vector.multi_reduction <add>, %343, %cst_86 [1] : vector<64x8xf32> to vector<64xf32>
    %345 = vector.shape_cast %344 : vector<64xf32> to vector<64x1xf32>
    %346 = math.log %345 : vector<64x1xf32>
    %347 = vector.broadcast %346 : vector<64x1xf32> to vector<64x8xf32>
    %348 = arith.subf %342, %347 : vector<64x8xf32>
    %c0_87 = arith.constant 0 : index
    %c0_88 = arith.constant 0 : index
    %349 = vector.load %arg8[%c0_87, %c0_88] : memref<64x8xf32, #tpu.memory_space<vmem>>, vector<64x8xf32>
    tpu.vector_store %arg8[%c0_87, %c0_88], %348 {strides = array<i32>} : memref<64x8xf32, #tpu.memory_space<vmem>>, vector<64x8xf32>,
    return
  }
  func.func @transform_0(%arg0: i32) -> (i32, i32) {
    %c0_i32 = arith.constant 0 : i32
    %c0_i32_0 = arith.constant 0 : i32
    %c0_i32_1 = arith.constant 0 : i32
    return %c0_i32, %c0_i32_0 : i32, i32
  }
  func.func @transform_1(%arg0: i32) -> (i32, i32) {
    %c0_i32 = arith.constant 0 : i32
    %c0_i32_0 = arith.constant 0 : i32
    %c0_i32_1 = arith.constant 0 : i32
    return %c0_i32, %c0_i32_0 : i32, i32
  }
  func.func @transform_2(%arg0: i32) -> (i32, i32) {
    %c0_i32 = arith.constant 0 : i32
    %c0_i32_0 = arith.constant 0 : i32
    %c0_i32_1 = arith.constant 0 : i32
    return %c0_i32, %c0_i32_0 : i32, i32
  }
  func.func @transform_3(%arg0: i32) -> (i32, i32) {
    %c0_i32 = arith.constant 0 : i32
    %c0_i32_0 = arith.constant 0 : i32
    %c0_i32_1 = arith.constant 0 : i32
    return %c0_i32, %c0_i32_0 : i32, i32
  }
  func.func @transform_4(%arg0: i32) -> (i32, i32) {
    %c0_i32 = arith.constant 0 : i32
    %c0_i32_0 = arith.constant 0 : i32
    %c0_i32_1 = arith.constant 0 : i32
    return %c0_i32, %c0_i32_0 : i32, i32
  }
  func.func @transform_5(%arg0: i32) -> (i32, i32) {
    %c0_i32 = arith.constant 0 : i32
    %c0_i32_0 = arith.constant 0 : i32
    %c0_i32_1 = arith.constant 0 : i32
    return %c0_i32, %c0_i32_0 : i32, i32
  }
  func.func @transform_6(%arg0: i32) -> (i32, i32) {
    %c0_i32 = arith.constant 0 : i32
    %c0_i32_0 = arith.constant 0 : i32
    %c0_i32_1 = arith.constant 0 : i32
    return %c0_i32, %c0_i32_0 : i32, i32
  }
  func.func @transform_7(%arg0: i32) -> (i32, i32) {
    %c0_i32 = arith.constant 0 : i32
    %c0_i32_0 = arith.constant 0 : i32
    %c0_i32_1 = arith.constant 0 : i32
    return %c0_i32, %c0_i32_0 : i32, i32
  }
}

</mosaic_0001>

<bundles_post_ra>
// kernel: tpu_custom_call.1
= control target key start
LH: loop header
LB: loop body
LE: loop exit
PB: predicated region body
PF: predicated region fallthrough
CT: control target
= control target key end

     0   :  { %vm43_vm0 = vcmask 130048   ;;  %v1741_v10 = vmov 0.0|0.0   ;;  %vm1742_vm1 = vmmov 0   ;;  %v1743_v16 = vmov 0.0   ;;  %s2162_s2 = inlined_call_operand.vmem [shape: f32[16,128], index: 2, kind: input, shape index: {}]   ;;  %s2163_s1 = inlined_call_operand.vmem [shape: f32[64,16], index: 1, kind: input, shape index: {}]   ;;  %s2164_s3 = inlined_call_operand.vmem [shape: f32[32,128], index: 3, kind: input, shape index: {}]   ;;  %s2165_s0 = inlined_call_operand.vmem [shape: s32[8,1], index: 0, kind: input, shape index: {}]   ;;  %s2166_s4 = inlined_call_operand.vmem [shape: f32[1,128], index: 4, kind: input, shape index: {}]   ;;  %s2167_s5 = inlined_call_operand.vmem [shape: f32[32,8], index: 5, kind: input, shape index: {}]   ;;  %s2168_s6 = inlined_call_operand.vmem [shape: f32[1,8], index: 6, kind: input, shape index: {}]   ;;  %s2169_s7 = inlined_call_operand.vmem [shape: f32[64,8], index: 7, kind: output, shape index: {}]  }
   0x1   :  { %v34_v0 = vld [vmem:[%s2162_s2] sm:$0xff]  ;;  %v35_v1 = vld [vmem:[%s2162_s2 + $0x8] sm:$0xff]  ;;  %v32_v11 = vld [vmem:[%s2163_s1 + $0x30] sm:$0xff]  ;;  %v1744_v17 = vmov 0   ;;  %vm187_vm4 = vcmask 261120  }
   0x2   :  { %v30_v2 = vld [vmem:[%s2163_s1 + $0x20] sm:$0xff]  ;;  %v1575_v3 = vpack.c.bf16 %v35_v1, %v34_v0  ;;  %v183_v5 = vld [vmem:[%s2164_s3 + $0x8] sm:$0xff]  ;;  %v184_v12 = vld [vmem:[%s2164_s3 + $0x10] sm:$0xff]  ;;  %1643 = vset.pattern.permute.xlu1 %v1744_v17  ;;  %1644 = vset.pattern.permute.xlu0 %v1744_v17 }
   0x3   :  { %1461 = vmatprep.mubr.msk.f32.mxu1 %vm43_vm0, %v30_v2  ;;  %v182_v4 = vld [vmem:[%s2164_s3] sm:$0xff]  ;;  %v31_v7 = vld [vmem:[%s2163_s1 + $0x28] sm:$0xff]  ;;  %v185_v13 = vld [vmem:[%s2164_s3 + $0x18] sm:$0xff] }
   0x4   :  { %v26_v6 = vld [vmem:[%s2163_s1] sm:$0xff]  ;;  %1635 = vmatprep.subr.bf16.mxu1 %v1575_v3  ;;  %1576 = vmatprep.subr.bf16.mxu0 %v1575_v3  ;;  %v1809_v8 = vpack.c.bf16 %v183_v5, %v182_v4  ;;  %v27_v9 = vld [vmem:[%s2163_s1 + $0x8] sm:$0xff]  ;;  %v33_v14 = vld [vmem:[%s2163_s1 + $0x38] sm:$0xff]  ;;  %v1833_v15 = vpack.c.bf16 %v185_v13, %v184_v12 }
   0x5   :  { %1636 = vmatpush3.bf16.msra.mxu1 %v1575_v3  ;;  %1578 = vmatpush3.bf16.msra.mxu0 %v1575_v3  ;;  %v1856_v18 = vld [vmem:[%s2165_s0] sm:$0xff]  ;;  %s1745_s0 = smov 64   ;;  %v28_v63 = vld [vmem:[%s2163_s1 + $0x10] sm:$0xff]  ;;  %v29_v0 = vld [vmem:[%s2163_s1 + $0x18] sm:$0xff] }
   0x6   :  { %1579 = vmatprep.subr.bf16.mxu1 %v1741_v10  ;;  %1455 = vmatprep.mubr.msk.f32.mxu0 %vm43_vm0, %v26_v6  ;;  %vm286_vm2 = vcmp.gt.s32.totalorder %v1856_v18, 0  ;;  %v1868_v24 = vld [vmem:[%s2166_s4] ss:$0 sm:$0xff]  ;;  %s1746_s4 = smov 32   ;;  %vm397_vm5 = vcmp.gt.s32.totalorder %v1856_v18, 1  ;;  %vm512_vm7 = vcmp.gt.s32.totalorder %v1856_v18, 2 }
   0x7   :  { %1591 = vmatprep.subr.bf16.mxu0 %v1741_v10  ;;  %v287_v19 = vsel %vm286_vm2, 1, %v1744_v17  ;;  %v398_v52 = vsel %vm397_vm5, 1, %v1744_v17  ;;  %vm627_vm9 = vcmp.gt.s32.totalorder %v1856_v18, 3  ;;  %vm742_vm11 = vcmp.gt.s32.totalorder %v1856_v18, 4 }
   0x8   :  { %1462 = vmatmul.mubr.msk.f32.vlgmr.msra.gmra.mrb[0].mxu1 %vm43_vm0, %v31_v7  ;;  %1456 = vmatmul.mubr.msk.f32.vlgmr.msra.gmra.mrb[0].mxu0 %vm43_vm0, %v27_v9  ;;  %vm857_vm13 = vcmp.gt.s32.totalorder %v1856_v18, 5  ;;  %vm972_vm15 = vcmp.gt.s32.totalorder %v1856_v18, 6  ;;  %vm1247_vm2 = vcmask 64512  }
   0x9   :  { %1581 = vmatpush3.bf16.msra.mxu1 %v1809_v8  ;;  %1464 = vmatprep.mubr.msk.f32.mxu1 %vm43_vm0, %v32_v11 }
   0xa   :  { %1582 = vmatprep.subr.bf16.mxu1 %v1741_v10  ;;  %1593 = vmatpush3.bf16.msra.mxu0 %v1809_v8 }
   0xb   :  { %1594 = vmatprep.subr.bf16.mxu0 %v1741_v10  ;;  %289 = vperm.xlu1 %1643, %v287_v19  }
   0xc   :  { %1465 = vmatmul.mubr.msk.f32.gmra.mrb[2].mxu1 %vm43_vm0, %v33_v14  ;;  %1458 = vmatprep.mubr.msk.f32.mxu0 %vm43_vm0, %v28_v63 }
   0xd   :  { %1584 = vmatpush3.bf16.msra.mxu1 %v1833_v15  ;;  %1475 = vmatprep.mubr.msk.f32.mxu1 %vm1742_vm1, %v1743_v16 }
   0xe   :  { %1585 = vmatprep.subr.bf16.mxu1 %v1741_v10  ;;  %1596 = vmatpush3.bf16.msra.mxu0 %v1833_v15 }
   0xf   :  { %1603 = vmatprep.subr.bf16.mxu0 %v1741_v10  ;;  %1459 = vmatmul.mubr.msk.f32.gmra.mrb[2].mxu0 %vm43_vm0, %v29_v0 }
  0x10   :  { %1476 = vmatmul.mubr.f32.vlgmr.msra.gmra.mrb[4].mxu1 %v1743_v16  ;;  %1497 = vmatprep.mubr.msk.f32.mxu0 %vm1742_vm1, %v1743_v16 }
  0x11   :  { %1587 = vmatpush3.bf16.msra.mxu1 %v1809_v8  ;;  %1486 = vmatprep.mubr.msk.f32.mxu1 %vm1742_vm1, %v1743_v16 }
  0x12   :  { %1588 = vmatprep.subr.bf16.mxu1 %v1741_v10 }
  0x15   :  { %1590 = vmatpush3.bf16.msra.mxu1 %v1833_v15 }
  0x16   :  { %1597 = vmatprep.subr.bf16.mxu1 %v1741_v10 }
  0x8a   :  { %v290_v42 = vpop.permute.xlu1 %289 }
  0x8b   :  { %vm291_vm3 = vcmp.eq.s32.totalorder %v290_v42, 1 }
  0xdb   :  { %v1861_v20 = vpop.f32.mrb[0].mxu1  ;;  %v1457_v21 = vpop.f32.mrb[0].mxu0 }
  0xdc   :  { %v1863_v22 = vpop.f32.mrb[1].mxu1  ;;  %v134_v23 = vpop.f32.mrb[1].mxu0  ;;  %v140_v47 = vadd.f32 %v1457_v21, %v1868_v24  ;;  %v513_v21 = vsel %vm512_vm7, 1, %v1744_v17 }
  0xdd   :  { %v135_v27 = vadd.f32 %v1868_v24, %v134_v23  ;;  %v155_v0 = vadd.f32 %v1868_v24, %v1863_v22 }
  0xdf   :  { %v1870_v25 = vpop.f32.mrb[2].mxu1 }
  0xe0   :  { %v1872_v26 = vpop.f32.mrb[3].mxu1 }
  0xe2   :  { %v1460_v6 = vpop.f32.mrb[2].mxu0 }
  0xe3   :  { %v257_v28 = vpop.f32.mrb[4].mxu1  ;;  %v144_v7 = vpop.f32.mrb[3].mxu0  ;;  %v150_v42 = vadd.f32 %v1460_v6, %v1868_v24 }
  0xe4   :  { %v261_v29 = vadd.f32 %v257_v28, %v135_v27  ;;  %v1477_v30 = vpop.f32.mrb[5].mxu1  ;;  %v145_v11 = vadd.f32 %v1868_v24, %v144_v7  ;;  %v743_v7 = vsel %vm742_vm11, 1, %v1744_v17 }
  0xe6   :  { %1645 = vtanh.f32 %v261_v29  ;;  %v1365_v32 = vmul.f32 -1.442695, %v261_v29 }
  0xe8   :  { %1647 = vpow2.f32 %v1365_v32 }
  0xf0   :  { %v1646_v31 = vpop.eup %1645 }
  0xf1   :  { %271 = vrot.lane.b32.xlu0 %v1646_v31, %s1745_s0 }
  0xf2   :  { %v1648_v33 = vpop.eup %1647 }
  0xf3   :  { %v265_v34 = vadd.f32 1.0, %v1648_v33 }
  0xf5   :  { %1649 = vrcp.f32 %v265_v34 }
  0xff   :  { %v1650_v35 = vpop.eup %1649 }
 0x100   :  { %v269_v38 = vmul.f32 0.0, %v1650_v35 }
 0x163   :  { %v272_v36 = vpop.permute.xlu0 %271 }
 0x164   :  { %v274_v37 = vmul.f32 %v1650_v35, %v272_v36 }
 0x166   :  { %276 = vrot.lane.b32.xlu0 %v274_v37, %s1746_s4 }
 0x1d8   :  { %v277_v39 = vpop.permute.xlu0 %276 }
 0x1d9   :  { %v279_v40 = vadd.f32 %v277_v39, %v269_v38 }
 0x1db   :  { %1651 = vtanh.f32 %v279_v40  ;;  %v292_v59 = vsel %vm291_vm3, %v279_v40, 0.0 }
 0x1e5   :  { %v1652_v41 = vpop.eup %1651 }
 0x1e6   :  { %282 = vrot.lane.b32.xlu1 %v1652_v41, %s1745_s0 }
 0x258   :  { %v283_v43 = vpop.permute.xlu1 %282 }
 0x259   :  { %v285_v44 = vmul.f32 %v1650_v35, %v283_v43 }
 0x25b   :  { %v293_v45 = vsel %vm291_vm3, %v285_v44, 0.0 }
 0x25c   :  { %295 = vrot.lane.b32.xlu0 %v293_v45, %s1746_s4 }
 0x2ce   :  { %v296_v46 = vpop.permute.xlu0 %295 }
 0x2cf   :  { %298 = vst.msk [vmem:[#allocation3] sm:$0xff] %vm187_vm4, %v296_v46  ;;  %1487 = vmatmul.mubr.msk.f32.vlgmr.msra.gmra.mrb[6].mxu1 %vm187_vm4, %v296_v46 }
 0x2d0   :  { %1599 = vmatpush3.bf16.msra.mxu1 %v1809_v8  ;;  %1508 = vmatprep.mubr.msk.f32.mxu1 %vm1742_vm1, %v1743_v16 }
 0x2d1   :  { %1600 = vmatprep.subr.bf16.mxu1 %v1741_v10 }
 0x2d4   :  { %1602 = vmatpush3.bf16.msra.mxu1 %v1833_v15 }
 0x2d5   :  { %1609 = vmatprep.subr.bf16.mxu1 %v1741_v10 }
 0x3a2   :  { %v368_v48 = vpop.f32.mrb[6].mxu1 }
 0x3a3   :  { %v372_v49 = vadd.f32 %v368_v48, %v140_v47  ;;  %v1488_v50 = vpop.f32.mrb[7].mxu1  ;;  %v628_v47 = vsel %vm627_vm9, 1, %v1744_v17 }
 0x3a5   :  { %1653 = vtanh.f32 %v372_v49  ;;  %v1367_v53 = vmul.f32 -1.442695, %v372_v49 }
 0x3a7   :  { %1655 = vpow2.f32 %v1367_v53 }
 0x3af   :  { %v1654_v51 = vpop.eup %1653 }
 0x3b0   :  { %382 = vrot.lane.b32.xlu1 %v1654_v51, %s1745_s0 }
 0x3b1   :  { %v1656_v54 = vpop.eup %1655 }
 0x3b2   :  { %v376_v55 = vadd.f32 1.0, %v1656_v54 }
 0x3b4   :  { %400 = vperm.xlu1 %1643, %v398_v52   ;;  %1657 = vrcp.f32 %v376_v55 }
 0x3be   :  { %v1658_v56 = vpop.eup %1657 }
 0x3bf   :  { %v380_v60 = vmul.f32 %v1658_v56, %v292_v59 }
 0x422   :  { %v383_v57 = vpop.permute.xlu1 %382 }
 0x423   :  { %v385_v58 = vmul.f32 %v1658_v56, %v383_v57 }
 0x425   :  { %387 = vrot.lane.b32.xlu0 %v385_v58, %s1746_s4 }
 0x433   :  { %v1905_v2 = vpop.permute.xlu1 %400 }
 0x434   :  { %vm402_vm6 = vcmp.eq.s32.totalorder %v1905_v2, 1 }
 0x497   :  { %v388_v61 = vpop.permute.xlu0 %387 }
 0x498   :  { %v390_v62 = vadd.f32 %v388_v61, %v380_v60 }
 0x49a   :  { %1659 = vtanh.f32 %v390_v62  ;;  %v403_v32 = vsel %vm402_vm6, %v390_v62, %v292_v59 }
 0x4a4   :  { %v1660_v1 = vpop.eup %1659 }
 0x4a5   :  { %393 = vrot.lane.b32.xlu0 %v1660_v1, %s1745_s0 }
 0x517   :  { %v394_v3 = vpop.permute.xlu0 %393 }
 0x518   :  { %v1907_v4 = vmul.f32 %v1658_v56, %v394_v3 }
 0x51a   :  { %v404_v5 = vsel %vm402_vm6, %v1907_v4, %v293_v45 }
 0x51b   :  { %413 = vrot.lane.b32.xlu1 %v404_v5, %s1746_s4 }
 0x58d   :  { %v414_v9 = vpop.permute.xlu1 %413 }
 0x58e   :  { %1498 = vmatmul.mubr.msk.f32.vlgmr.msra.gmra.mrb[4].mxu0 %vm187_vm4, %v414_v9 }
 0x58f   :  { %1605 = vmatpush3.bf16.msra.mxu0 %v1809_v8  ;;  %1519 = vmatprep.mubr.msk.f32.mxu0 %vm1742_vm1, %v1743_v16 }
 0x590   :  { %1606 = vmatprep.subr.bf16.mxu0 %v1741_v10 }
 0x593   :  { %1608 = vmatpush3.bf16.msra.mxu0 %v1833_v15 }
 0x594   :  { %1615 = vmatprep.subr.bf16.mxu0 %v1741_v10 }
 0x661   :  { %v483_v12 = vpop.f32.mrb[4].mxu0 }
 0x662   :  { %v487_v13 = vadd.f32 %v483_v12, %v145_v11  ;;  %v1499_v14 = vpop.f32.mrb[5].mxu0 }
 0x664   :  { %1661 = vtanh.f32 %v487_v13  ;;  %v1369_v23 = vmul.f32 -1.442695, %v487_v13 }
 0x666   :  { %1663 = vpow2.f32 %v1369_v23 }
 0x66e   :  { %v1662_v19 = vpop.eup %1661 }
 0x66f   :  { %497 = vrot.lane.b32.xlu0 %v1662_v19, %s1745_s0 }
 0x670   :  { %v1664_v27 = vpop.eup %1663 }
 0x671   :  { %v491_v28 = vadd.f32 1.0, %v1664_v27 }
 0x673   :  { %515 = vperm.xlu0 %1644, %v513_v21   ;;  %1665 = vrcp.f32 %v491_v28 }
 0x67d   :  { %v1666_v29 = vpop.eup %1665 }
 0x67e   :  { %v495_v33 = vmul.f32 %v1666_v29, %v403_v32 }
 0x6e1   :  { %v498_v30 = vpop.permute.xlu0 %497 }
 0x6e2   :  { %v500_v31 = vmul.f32 %v1666_v29, %v498_v30 }
 0x6e4   :  { %502 = vrot.lane.b32.xlu1 %v500_v31, %s1746_s4 }
 0x6f2   :  { %v1929_v37 = vpop.permute.xlu0 %515 }
 0x6f3   :  { %vm517_vm8 = vcmp.eq.s32.totalorder %v1929_v37, 1 }
 0x756   :  { %v503_v34 = vpop.permute.xlu1 %502 }
 0x757   :  { %v505_v35 = vadd.f32 %v503_v34, %v495_v33  ;;  %v160_v34 = vadd.f32 %v1861_v20, %v1868_v24 }
 0x759   :  { %1667 = vtanh.f32 %v505_v35  ;;  %v518_v54 = vsel %vm517_vm8, %v505_v35, %v403_v32 }
 0x763   :  { %v1668_v36 = vpop.eup %1667 }
 0x764   :  { %508 = vrot.lane.b32.xlu1 %v1668_v36, %s1745_s0 }
 0x7d6   :  { %v509_v38 = vpop.permute.xlu1 %508 }
 0x7d7   :  { %v1931_v39 = vmul.f32 %v1666_v29, %v509_v38 }
 0x7d9   :  { %v519_v40 = vsel %vm517_vm8, %v1931_v39, %v404_v5 }
 0x7da   :  { %528 = vrot.lane.b32.xlu1 %v519_v40, %s1746_s4 }
 0x84c   :  { %v529_v41 = vpop.permute.xlu1 %528 }
 0x84d   :  { %1509 = vmatmul.mubr.msk.f32.vlgmr.msra.gmra.mrb[8].mxu1 %vm187_vm4, %v529_v41 }
 0x84e   :  { %1611 = vmatpush3.bf16.msra.mxu1 %v1809_v8  ;;  %1530 = vmatprep.mubr.msk.f32.mxu1 %vm1742_vm1, %v1743_v16 }
 0x84f   :  { %1612 = vmatprep.subr.bf16.mxu1 %v1741_v10 }
 0x852   :  { %1614 = vmatpush3.bf16.msra.mxu1 %v1833_v15 }
 0x853   :  { %1621 = vmatprep.subr.bf16.mxu1 %v1741_v10 }
 0x920   :  { %v598_v43 = vpop.f32.mrb[8].mxu1 }
 0x921   :  { %v602_v44 = vadd.f32 %v598_v43, %v150_v42  ;;  %v1510_v45 = vpop.f32.mrb[9].mxu1 }
 0x923   :  { %1669 = vtanh.f32 %v602_v44  ;;  %v1371_v48 = vmul.f32 -1.442695, %v602_v44 }
 0x925   :  { %1671 = vpow2.f32 %v1371_v48 }
 0x92d   :  { %v1670_v46 = vpop.eup %1669 }
 0x92e   :  { %612 = vrot.lane.b32.xlu0 %v1670_v46, %s1745_s0 }
 0x92f   :  { %v1672_v49 = vpop.eup %1671 }
 0x930   :  { %v606_v50 = vadd.f32 1.0, %v1672_v49 }
 0x932   :  { %630 = vperm.xlu0 %1644, %v628_v47   ;;  %1673 = vrcp.f32 %v606_v50 }
 0x93c   :  { %v1674_v51 = vpop.eup %1673 }
 0x93d   :  { %v610_v55 = vmul.f32 %v1674_v51, %v518_v54 }
 0x9a0   :  { %v613_v52 = vpop.permute.xlu0 %612 }
 0x9a1   :  { %v615_v53 = vmul.f32 %v1674_v51, %v613_v52 }
 0x9a3   :  { %617 = vrot.lane.b32.xlu1 %v615_v53, %s1746_s4  ;;  %v1099_v53 = vld [vmem:[#allocation3] sm:$0xff] }
 0x9b1   :  { %v1953_v59 = vpop.permute.xlu0 %630 }
 0x9b2   :  { %vm632_vm10 = vcmp.eq.s32.totalorder %v1953_v59, 1 }
 0xa15   :  { %v618_v56 = vpop.permute.xlu1 %617 }
 0xa16   :  { %v620_v57 = vadd.f32 %v618_v56, %v610_v55 }
 0xa18   :  { %1675 = vtanh.f32 %v620_v57  ;;  %v633_v19 = vsel %vm632_vm10, %v620_v57, %v518_v54  ;;  %v165_v54 = vadd.f32 %v1868_v24, %v1872_v26 }
 0xa22   :  { %v1676_v58 = vpop.eup %1675 }
 0xa23   :  { %623 = vrot.lane.b32.xlu1 %v1676_v58, %s1745_s0 }
 0xa95   :  { %v624_v60 = vpop.permute.xlu1 %623 }
 0xa96   :  { %v1955_v61 = vmul.f32 %v1674_v51, %v624_v60  ;;  %v973_v60 = vsel %vm972_vm15, 1, %v1744_v17 }
 0xa98   :  { %v634_v62 = vsel %vm632_vm10, %v1955_v61, %v519_v40 }
 0xa99   :  { %643 = vrot.lane.b32.xlu0 %v634_v62, %s1746_s4 }
 0xb0b   :  { %v644_v63 = vpop.permute.xlu0 %643 }
 0xb0c   :  { %1520 = vmatmul.mubr.msk.f32.vlgmr.msra.gmra.mrb[6].mxu0 %vm187_vm4, %v644_v63 }
 0xb0d   :  { %1617 = vmatpush3.bf16.msra.mxu0 %v1809_v8  ;;  %1541 = vmatprep.mubr.msk.f32.mxu0 %vm1742_vm1, %v1743_v16 }
 0xb0e   :  { %1618 = vmatprep.subr.bf16.mxu0 %v1741_v10 }
 0xb11   :  { %1620 = vmatpush3.bf16.msra.mxu0 %v1833_v15 }
 0xbdf   :  { %v713_v1 = vpop.f32.mrb[6].mxu0 }
 0xbe0   :  { %v717_v3 = vadd.f32 %v713_v1, %v155_v0  ;;  %v1521_v5 = vpop.f32.mrb[7].mxu0 }
 0xbe2   :  { %1677 = vtanh.f32 %v717_v3  ;;  %v1373_v9 = vmul.f32 -1.442695, %v717_v3 }
 0xbe4   :  { %1679 = vpow2.f32 %v1373_v9 }
 0xbec   :  { %v1678_v6 = vpop.eup %1677 }
 0xbed   :  { %727 = vrot.lane.b32.xlu1 %v1678_v6, %s1745_s0 }
 0xbee   :  { %v1680_v11 = vpop.eup %1679 }
 0xbef   :  { %v721_v12 = vadd.f32 1.0, %v1680_v11 }
 0xbf1   :  { %745 = vperm.xlu1 %1643, %v743_v7   ;;  %1681 = vrcp.f32 %v721_v12 }
 0xbfb   :  { %v1682_v13 = vpop.eup %1681 }
 0xbfc   :  { %v725_v21 = vmul.f32 %v1682_v13, %v633_v19 }
 0xc5f   :  { %v728_v14 = vpop.permute.xlu1 %727 }
 0xc60   :  { %v730_v22 = vmul.f32 %v1682_v13, %v728_v14 }
 0xc62   :  { %732 = vrot.lane.b32.xlu0 %v730_v22, %s1746_s4 }
 0xc70   :  { %v1977_v29 = vpop.permute.xlu1 %745 }
 0xc71   :  { %vm747_vm12 = vcmp.eq.s32.totalorder %v1977_v29, 1 }
 0xcd4   :  { %v733_v23 = vpop.permute.xlu0 %732 }
 0xcd5   :  { %v735_v27 = vadd.f32 %v733_v23, %v725_v21  ;;  %v170_v21 = vadd.f32 %v1870_v25, %v1868_v24  ;;  %v1108_v24 = vld [vmem:[%s2167_s5 + $0x8] sm:$0xff] }
 0xcd7   :  { %1683 = vtanh.f32 %v735_v27  ;;  %v748_v43 = vsel %vm747_vm12, %v735_v27, %v633_v19 }
 0xce1   :  { %v1684_v28 = vpop.eup %1683 }
 0xce2   :  { %738 = vrot.lane.b32.xlu0 %v1684_v28, %s1745_s0 }
 0xd54   :  { %v739_v30 = vpop.permute.xlu0 %738 }
 0xd55   :  { %v1979_v31 = vmul.f32 %v1682_v13, %v739_v30 }
 0xd57   :  { %v749_v32 = vsel %vm747_vm12, %v1979_v31, %v634_v62 }
 0xd58   :  { %758 = vrot.lane.b32.xlu1 %v749_v32, %s1746_s4 }
 0xdca   :  { %v759_v33 = vpop.permute.xlu1 %758 }
 0xdcb   :  { %1531 = vmatmul.mubr.msk.f32.vlgmr.msra.gmra.mrb[10].mxu1 %vm187_vm4, %v759_v33  ;;  %v1107_v33 = vld [vmem:[%s2167_s5] sm:$0xff] }
 0xdcc   :  { %1623 = vmatpush3.bf16.msra.mxu1 %v1809_v8  ;;  %1552 = vmatprep.mubr.msk.f32.mxu1 %vm1742_vm1, %v1743_v16  ;;  %v858_v8 = vsel %vm857_vm13, 1, %v1744_v17  ;;  %vm1087_vm1 = vcmp.gt.s32.totalorder %v1856_v18, 7  ;;  %v1627_v25 = vpack.c.bf16 %v1108_v24, %v1107_v33  ;;  %v1110_v18 = vld [vmem:[%s2167_s5 + $0x18] sm:$0xff] }
 0xdcd   :  { %1624 = vmatprep.subr.bf16.mxu1 %v1741_v10 }
 0xdce   :  { %1628 = vmatprep.subr.bf16.mxu0 %v1627_v25 }
 0xdd0   :  { %1626 = vmatpush3.bf16.msra.mxu1 %v1833_v15 }
 0xe9e   :  { %v828_v35 = vpop.f32.mrb[10].mxu1 }
 0xe9f   :  { %v832_v36 = vadd.f32 %v828_v35, %v160_v34  ;;  %v1532_v38 = vpop.f32.mrb[11].mxu1  ;;  %v405_v34 = vsel %vm402_vm6, %v1907_v4, 0.0 }
 0xea1   :  { %1685 = vtanh.f32 %v832_v36  ;;  %v1375_v16 = vmul.f32 -1.442695, %v832_v36  ;;  %v635_v36 = vsel %vm632_vm10, %v1955_v61, 0.0 }
 0xea3   :  { %1687 = vpow2.f32 %v1375_v16 }
 0xeab   :  { %v1686_v40 = vpop.eup %1685 }
 0xeac   :  { %842 = vrot.lane.b32.xlu0 %v1686_v40, %s1745_s0 }
 0xead   :  { %v1688_v10 = vpop.eup %1687 }
 0xeae   :  { %v836_v41 = vadd.f32 1.0, %v1688_v10 }
 0xeb0   :  { %860 = vperm.xlu0 %1644, %v858_v8   ;;  %1689 = vrcp.f32 %v836_v41 }
 0xeba   :  { %v1690_v15 = vpop.eup %1689 }
 0xebb   :  { %v840_v44 = vmul.f32 %v1690_v15, %v748_v43 }
 0xf1e   :  { %v843_v42 = vpop.permute.xlu0 %842 }
 0xf1f   :  { %v845_v20 = vmul.f32 %v1690_v15, %v843_v42 }
 0xf21   :  { %847 = vrot.lane.b32.xlu1 %v845_v20, %s1746_s4 }
 0xf2f   :  { %v2001_v48 = vpop.permute.xlu0 %860 }
 0xf30   :  { %vm862_vm14 = vcmp.eq.s32.totalorder %v2001_v48, 1  ;;  %v750_v48 = vsel %vm747_vm12, %v1979_v31, 0.0 }
 0xf93   :  { %v848_v45 = vpop.permute.xlu1 %847 }
 0xf94   :  { %v850_v46 = vadd.f32 %v848_v45, %v840_v44 }
 0xf96   :  { %1691 = vtanh.f32 %v850_v46  ;;  %v863_v5 = vsel %vm862_vm14, %v850_v46, %v748_v43 }
 0xfa0   :  { %v1692_v47 = vpop.eup %1691 }
 0xfa1   :  { %853 = vrot.lane.b32.xlu1 %v1692_v47, %s1745_s0  ;;  %v520_v47 = vsel %vm517_vm8, %v1931_v39, 0.0 }
0x1013   :  { %v854_v49 = vpop.permute.xlu1 %853 }
0x1014   :  { %v2003_v50 = vmul.f32 %v1690_v15, %v854_v49 }
0x1016   :  { %v864_v51 = vsel %vm862_vm14, %v2003_v50, %v749_v32  ;;  %v1088_v32 = vsel %vm1087_vm1, 1, %v1744_v17  ;;  %v1109_v17 = vld [vmem:[%s2167_s5 + $0x10] sm:$0xff]  ;;  %v865_v2 = vsel %vm862_vm14, %v2003_v50, 0.0  ;;  %v1380_v50 = vld [vmem:[%s2168_s6] ss:$0 sm:$0xff] }
0x1017   :  { %873 = vrot.lane.b32.xlu0 %v864_v51, %s1746_s4  ;;  %v1631_v35 = vpack.c.bf16 %v1110_v18, %v1109_v17 }
0x1089   :  { %v874_v52 = vpop.permute.xlu0 %873 }
0x108a   :  { %1542 = vmatmul.mubr.msk.f32.vlgmr.msra.gmra.mrb[8].mxu0 %vm187_vm4, %v874_v52 }
0x108b   :  { %1563 = vmatprep.mubr.msk.f32.mxu0 %vm187_vm4, %v1099_v53  ;;  %1630 = vmatpush3.bf16.msra.mxu0 %v1627_v25 }
0x108c   :  { %1632 = vmatprep.subr.bf16.mxu0 %v1631_v35 }
0x108f   :  { %1634 = vmatpush3.bf16.msra.mxu0 %v1631_v35 }
0x115d   :  { %v943_v55 = vpop.f32.mrb[8].mxu0 }
0x115e   :  { %v947_v56 = vadd.f32 %v943_v55, %v165_v54  ;;  %v1543_v57 = vpop.f32.mrb[9].mxu0 }
0x1160   :  { %1693 = vtanh.f32 %v947_v56  ;;  %v1377_v62 = vmul.f32 -1.442695, %v947_v56 }
0x1162   :  { %1695 = vpow2.f32 %v1377_v62 }
0x116a   :  { %v1694_v58 = vpop.eup %1693 }
0x116b   :  { %957 = vrot.lane.b32.xlu1 %v1694_v58, %s1745_s0 }
0x116c   :  { %v1696_v63 = vpop.eup %1695 }
0x116d   :  { %v951_v0 = vadd.f32 1.0, %v1696_v63 }
0x116f   :  { %975 = vperm.xlu1 %1643, %v973_v60   ;;  %1697 = vrcp.f32 %v951_v0 }
0x1179   :  { %v1698_v1 = vpop.eup %1697 }
0x117a   :  { %v955_v6 = vmul.f32 %v1698_v1, %v863_v5 }
0x11dd   :  { %v958_v3 = vpop.permute.xlu1 %957 }
0x11de   :  { %v960_v26 = vmul.f32 %v1698_v1, %v958_v3 }
0x11e0   :  { %962 = vrot.lane.b32.xlu0 %v960_v26, %s1746_s4 }
0x11ee   :  { %v2021_v12 = vpop.permute.xlu1 %975 }
0x11ef   :  { %vm977_vm0 = vcmp.eq.s32.totalorder %v2021_v12, 1 }
0x1252   :  { %v963_v7 = vpop.permute.xlu0 %962 }
0x1253   :  { %v965_v9 = vadd.f32 %v963_v7, %v955_v6 }
0x1255   :  { %1699 = vtanh.f32 %v965_v9  ;;  %v978_v20 = vsel %vm977_vm0, %v965_v9, %v863_v5 }
0x125f   :  { %v1700_v11 = vpop.eup %1699 }
0x1260   :  { %968 = vrot.lane.b32.xlu0 %v1700_v11, %s1745_s0 }
0x12d2   :  { %v969_v13 = vpop.permute.xlu0 %968 }
0x12d3   :  { %v971_v14 = vmul.f32 %v1698_v1, %v969_v13 }
0x12d5   :  { %v979_v22 = vsel %vm977_vm0, %v971_v14, %v864_v51  ;;  %v980_v49 = vsel %vm977_vm0, %v971_v14, 0.0 }
0x12d6   :  { %988 = vrot.lane.b32.xlu1 %v979_v22, %s1746_s4 }
0x1348   :  { %v989_v19 = vpop.permute.xlu1 %988 }
0x1349   :  { %1553 = vmatmul.mubr.msk.f32.vlgmr.msra.gmra.mrb[12].mxu1 %vm187_vm4, %v989_v19 }
0x141c   :  { %v1058_v23 = vpop.f32.mrb[12].mxu1 }
0x141d   :  { %v1062_v27 = vadd.f32 %v1058_v23, %v170_v21  ;;  %v1554_v28 = vpop.f32.mrb[13].mxu1 }
0x141f   :  { %1701 = vtanh.f32 %v1062_v27  ;;  %v1379_v4 = vmul.f32 -1.442695, %v1062_v27 }
0x1421   :  { %1703 = vpow2.f32 %v1379_v4 }
0x1429   :  { %v1702_v30 = vpop.eup %1701 }
0x142a   :  { %1072 = vrot.lane.b32.xlu0 %v1702_v30, %s1745_s0 }
0x142b   :  { %v1704_v38 = vpop.eup %1703 }
0x142c   :  { %v1066_v40 = vadd.f32 1.0, %v1704_v38 }
0x142e   :  { %1090 = vperm.xlu0 %1644, %v1088_v32   ;;  %1705 = vrcp.f32 %v1066_v40 }
0x1432   :  { %407 = vrot.lane.b32.xlu0 %v405_v34, %s1746_s4 }
0x1436   :  { %637 = vrot.lane.b32.xlu0 %v635_v36, %s1746_s4 }
0x1438   :  { %v1706_v8 = vpop.eup %1705 }
0x1439   :  { %v1070_v43 = vmul.f32 %v1706_v8, %v978_v20 }
0x143a   :  { %867 = vrot.lane.b32.xlu0 %v865_v2, %s1746_s4 }
0x149c   :  { %v1073_v16 = vpop.permute.xlu0 %1072 }
0x149d   :  { %v1075_v10 = vmul.f32 %v1706_v8, %v1073_v16 }
0x149f   :  { %1077 = vrot.lane.b32.xlu1 %v1075_v10, %s1746_s4 }
0x14ad   :  { %v1091_v59 = vpop.permute.xlu0 %1090 }
0x14ae   :  { %vm1092_vm3 = vcmp.eq.s32.totalorder %v1091_v59, 1 }
0x14b1   :  { %v408_v61 = vpop.permute.xlu0 %407 }
0x14b2   :  { %410 = vst.msk [vmem:[#allocation3 + $0x8] sm:$0xff] %vm187_vm4, %v408_v61 }
0x14b5   :  { %v638_v41 = vpop.permute.xlu0 %637 }
0x14b6   :  { %640 = vst.msk [vmem:[#allocation3 + $0x18] sm:$0xff] %vm187_vm4, %v638_v41 }
0x14b9   :  { %v868_v15 = vpop.permute.xlu0 %867  ;;  %v1100_v42 = vld [vmem:[#allocation3 + $0x8] sm:$0xff] }
0x14ba   :  { %870 = vst.msk [vmem:[#allocation3 + $0x28] sm:$0xff] %vm187_vm4, %v868_v15  ;;  %1564 = vmatmul.mubr.msk.f32.vlgmr.msra.gmra.mrb[10].mxu0 %vm187_vm4, %v1100_v42 }
0x14bd   :  { %v1102_v58 = vld [vmem:[#allocation3 + $0x18] sm:$0xff] }
0x14c1   :  { %v1104_v62 = vld [vmem:[#allocation3 + $0x28] sm:$0xff] }
0x1511   :  { %v1078_v44 = vpop.permute.xlu1 %1077 }
0x1512   :  { %v1080_v45 = vadd.f32 %v1078_v44, %v1070_v43 }
0x1514   :  { %1707 = vtanh.f32 %v1080_v45 }
0x151e   :  { %v1708_v46 = vpop.eup %1707 }
0x151f   :  { %1083 = vrot.lane.b32.xlu1 %v1708_v46, %s1745_s0 }
0x1523   :  { %522 = vrot.lane.b32.xlu1 %v520_v47, %s1746_s4 }
0x1527   :  { %752 = vrot.lane.b32.xlu1 %v750_v48, %s1746_s4 }
0x152b   :  { %982 = vrot.lane.b32.xlu1 %v980_v49, %s1746_s4 }
0x158d   :  { %v1565_v51 = vpop.f32.mrb[10].mxu0 }
0x158e   :  { %v1208_v37 = vpop.f32.mrb[11].mxu0  ;;  %v1214_v0 = vadd.f32 %v1565_v51, %v1380_v50 }
0x158f   :  { %v1209_v39 = vadd.f32 %v1380_v50, %v1208_v37 }
0x1590   :  { %v1251_v1 = vsel %vm1247_vm2, %v1214_v0, -inf }
0x1591   :  { %v1084_v52 = vpop.permute.xlu1 %1083  ;;  %v1248_v53 = vsel %vm1247_vm2, %v1209_v39, -inf }
0x1592   :  { %v1086_v29 = vmul.f32 %v1706_v8, %v1084_v52  ;;  %1249 = vmax.xlane.f32.xlu1 %v1248_v53 }
0x1594   :  { %v1093_v31 = vsel %vm1092_vm3, %v1086_v29, 0.0 }
0x1595   :  { %1095 = vrot.lane.b32.xlu0 %v1093_v31, %s1746_s4  ;;  %v523_v54 = vpop.permute.xlu1 %522 }
0x1596   :  { %525 = vst.msk [vmem:[#allocation3 + $0x10] sm:$0xff] %vm187_vm4, %v523_v54 }
0x1599   :  { %v753_v55 = vpop.permute.xlu1 %752 }
0x159a   :  { %755 = vst.msk [vmem:[#allocation3 + $0x20] sm:$0xff] %vm187_vm4, %v753_v55 }
0x159d   :  { %v983_v56 = vpop.permute.xlu1 %982  ;;  %v1101_v57 = vld [vmem:[#allocation3 + $0x10] sm:$0xff] }
0x159e   :  { %985 = vst.msk [vmem:[#allocation3 + $0x30] sm:$0xff] %vm187_vm4, %v983_v56  ;;  %1566 = vmatprep.mubr.msk.f32.mxu0 %vm187_vm4, %v1101_v57 }
0x159f   :  { %1567 = vmatmul.mubr.msk.f32.gmra.mrb[12].mxu0 %vm187_vm4, %v1102_v58 }
0x15a1   :  { %v1103_v60 = vld [vmem:[#allocation3 + $0x20] sm:$0xff] }
0x15a2   :  { %1569 = vmatprep.mubr.msk.f32.mxu0 %vm187_vm4, %v1103_v60 }
0x15a3   :  { %1570 = vmatmul.mubr.msk.f32.gmra.mrb[14].mxu0 %vm187_vm4, %v1104_v62 }
0x15a5   :  { %v1105_v63 = vld [vmem:[#allocation3 + $0x30] sm:$0xff] }
0x15a6   :  { %1572 = vmatprep.mubr.msk.f32.mxu0 %vm187_vm4, %v1105_v63 }
0x15b4   :  { %1252 = vmax.xlane.f32.xlu0 %v1251_v1 }
0x1607   :  { %v1096_v3 = vpop.permute.xlu0 %1095 }
0x1608   :  { %1098 = vst.msk [vmem:[#allocation3 + $0x38] sm:$0xff] %vm187_vm4, %v1096_v3 }
0x160f   :  { %v1106_v26 = vld [vmem:[#allocation3 + $0x38] sm:$0xff] }
0x1610   :  { %1573 = vmatmul.mubr.msk.f32.gmra.mrb[16].mxu0 %vm187_vm4, %v1106_v26 }
0x161f   :  { %v1250_v28 = vpop.xlane.xlu1 %1249 }
0x1620   :  { %v2098_v32 = vsub.f32 %v1209_v39, %v1250_v28 }
0x1622   :  { %v1280_v24 = vmul.f32 1.442695, %v2098_v32 }
0x1641   :  { %v1253_v27 = vpop.xlane.xlu0 %1252 }
0x1642   :  { %v2096_v30 = vsub.f32 %v1214_v0, %v1253_v27 }
0x1644   :  { %v1282_v33 = vmul.f32 1.442695, %v2096_v30 }
0x1646   :  { %1709 = vpow2.f32 %v1282_v33 }
0x1647   :  { %1711 = vpow2.f32 %v1280_v24 }
0x1650   :  { %v1710_v36 = vpop.eup %1709 }
0x1651   :  { %v1712_v4 = vpop.eup %1711  ;;  %v1299_v38 = vsel %vm1247_vm2, %v1710_v36, 0.0 }
0x1652   :  { %v1296_v40 = vsel %vm1247_vm2, %v1712_v4, 0.0 }
0x1672   :  { %v1568_v5 = vpop.f32.mrb[12].mxu0 }
0x1673   :  { %v1224_v6 = vadd.f32 %v1568_v5, %v1380_v50  ;;  %v1218_v7 = vpop.f32.mrb[13].mxu0 }
0x1674   :  { %v1219_v9 = vadd.f32 %v1380_v50, %v1218_v7 }
0x1675   :  { %v1257_v11 = vsel %vm1247_vm2, %v1224_v6, -inf }
0x1676   :  { %v1571_v12 = vpop.f32.mrb[14].mxu0  ;;  %1258 = vmax.xlane.f32.xlu1 %v1257_v11  ;;  %v1254_v13 = vsel %vm1247_vm2, %v1219_v9, -inf }
0x1677   :  { %v1234_v14 = vadd.f32 %v1571_v12, %v1380_v50  ;;  %v1228_v22 = vpop.f32.mrb[15].mxu0  ;;  %1255 = vmax.xlane.f32.xlu0 %v1254_v13 }
0x1678   :  { %v1229_v19 = vadd.f32 %v1380_v50, %v1228_v22 }
0x1679   :  { %v1263_v21 = vsel %vm1247_vm2, %v1234_v14, -inf }
0x167a   :  { %1264 = vmax.xlane.f32.xlu1 %v1263_v21  ;;  %v1260_v23 = vsel %vm1247_vm2, %v1229_v19, -inf }
0x167b   :  { %1261 = vmax.xlane.f32.xlu0 %v1260_v23 }
0x16e3   :  { %v1574_v25 = vpop.f32.mrb[16].mxu0 }
0x16e4   :  { %v1244_v34 = vadd.f32 %v1574_v25, %v1380_v50  ;;  %v1238_v17 = vpop.f32.mrb[17].mxu0 }
0x16e5   :  { %v1239_v18 = vadd.f32 %v1380_v50, %v1238_v17 }
0x16e6   :  { %v1269_v35 = vsel %vm1247_vm2, %v1244_v34, -inf }
0x16e7   :  { %1270 = vmax.xlane.f32.xlu1 %v1269_v35  ;;  %v1266_v2 = vsel %vm1247_vm2, %v1239_v18, -inf }
0x16e8   :  { %1267 = vmax.xlane.f32.xlu0 %v1266_v2 }
0x16eb   :  { %1300 = vadd.xlane.f32.xlu1 %v1299_v38 }
0x16ec   :  { %1297 = vadd.xlane.f32.xlu0 %v1296_v40 }
0x1703   :  { %v1259_v8 = vpop.xlane.xlu1 %1258 }
0x1704   :  { %v2106_v16 = vsub.f32 %v1224_v6, %v1259_v8  ;;  %v1256_v10 = vpop.xlane.xlu0 %1255 }
0x1705   :  { %v2108_v59 = vsub.f32 %v1219_v9, %v1256_v10 }
0x1706   :  { %v1286_v61 = vmul.f32 1.442695, %v2106_v16 }
0x1707   :  { %v1284_v41 = vmul.f32 1.442695, %v2108_v59  ;;  %v1265_v15 = vpop.xlane.xlu1 %1264 }
0x1708   :  { %1713 = vpow2.f32 %v1286_v61  ;;  %v2112_v42 = vsub.f32 %v1234_v14, %v1265_v15  ;;  %v1262_v20 = vpop.xlane.xlu0 %1261 }
0x1709   :  { %1715 = vpow2.f32 %v1284_v41  ;;  %v2114_v43 = vsub.f32 %v1229_v19, %v1262_v20 }
0x170a   :  { %v1290_v44 = vmul.f32 1.442695, %v2112_v42 }
0x170b   :  { %v1288_v45 = vmul.f32 1.442695, %v2114_v43 }
0x170c   :  { %1717 = vpow2.f32 %v1290_v44 }
0x170d   :  { %1719 = vpow2.f32 %v1288_v45 }
0x1712   :  { %v1714_v46 = vpop.eup %1713 }
0x1713   :  { %v1716_v47 = vpop.eup %1715  ;;  %v1305_v48 = vsel %vm1247_vm2, %v1714_v46, 0.0 }
0x1714   :  { %1306 = vadd.xlane.f32.xlu1 %v1305_v48  ;;  %v1302_v49 = vsel %vm1247_vm2, %v1716_v47, 0.0 }
0x1715   :  { %1303 = vadd.xlane.f32.xlu0 %v1302_v49 }
0x1716   :  { %v1718_v50 = vpop.eup %1717 }
0x1717   :  { %v1720_v51 = vpop.eup %1719  ;;  %v1311_v37 = vsel %vm1247_vm2, %v1718_v50, 0.0 }
0x1718   :  { %1312 = vadd.xlane.f32.xlu1 %v1311_v37  ;;  %v1308_v39 = vsel %vm1247_vm2, %v1720_v51, 0.0 }
0x1719   :  { %1309 = vadd.xlane.f32.xlu0 %v1308_v39 }
0x1774   :  { %v1271_v52 = vpop.xlane.xlu1 %1270 }
0x1775   :  { %v1279_v53 = vsub.f32 %v1244_v34, %v1271_v52  ;;  %v1268_v29 = vpop.xlane.xlu0 %1267 }
0x1776   :  { %v1278_v31 = vsub.f32 %v1239_v18, %v1268_v29 }
0x1777   :  { %v1294_v54 = vmul.f32 1.442695, %v1279_v53 }
0x1778   :  { %v1292_v55 = vmul.f32 1.442695, %v1278_v31  ;;  %v1301_v56 = vpop.xlane.xlu1 %1300 }
0x1779   :  { %1721 = vpow2.f32 %v1294_v54  ;;  %v1298_v57 = vpop.xlane.xlu0 %1297 }
0x177a   :  { %1723 = vpow2.f32 %v1292_v55 }
0x177b   :  { %1725 = vlog2.f32 %v1301_v56 }
0x177c   :  { %1727 = vlog2.f32 %v1298_v57 }
0x1783   :  { %v1722_v58 = vpop.eup %1721 }
0x1784   :  { %v1724_v60 = vpop.eup %1723  ;;  %v1317_v62 = vsel %vm1247_vm2, %v1722_v58, 0.0 }
0x1785   :  { %v1726_v63 = vpop.eup %1725  ;;  %1318 = vadd.xlane.f32.xlu1 %v1317_v62  ;;  %v1314_v0 = vsel %vm1247_vm2, %v1724_v60, 0.0 }
0x1786   :  { %v1728_v1 = vpop.eup %1727  ;;  %v1323_v3 = vmul.f32 0.6931472, %v1726_v63  ;;  %1315 = vadd.xlane.f32.xlu0 %v1314_v0 }
0x1787   :  { %v1321_v26 = vmul.f32 0.6931472, %v1728_v1 }
0x1788   :  { %v1337_v5 = vsub.f32 %v2096_v30, %v1323_v3 }
0x1789   :  { %v1336_v6 = vsub.f32 %v2098_v32, %v1321_v26 }
0x178a   :  { %1345 = vst.msk [vmem:[%s2169_s7 + $0x8] sm:$0xff] %vm1247_vm2, %v1337_v5 }
0x178b   :  { %1344 = vst.msk [vmem:[%s2169_s7] sm:$0xff] %vm1247_vm2, %v1336_v6 }
0x17a1   :  { %v1307_v7 = vpop.xlane.xlu1 %1306 }
0x17a2   :  { %1729 = vlog2.f32 %v1307_v7  ;;  %v1304_v9 = vpop.xlane.xlu0 %1303 }
0x17a3   :  { %1731 = vlog2.f32 %v1304_v9 }
0x17a5   :  { %v1313_v11 = vpop.xlane.xlu1 %1312 }
0x17a6   :  { %1733 = vlog2.f32 %v1313_v11  ;;  %v1310_v12 = vpop.xlane.xlu0 %1309 }
0x17a7   :  { %1735 = vlog2.f32 %v1310_v12 }
0x17ac   :  { %v1730_v13 = vpop.eup %1729 }
0x17ad   :  { %v1732_v14 = vpop.eup %1731  ;;  %v1327_v22 = vmul.f32 0.6931472, %v1730_v13 }
0x17ae   :  { %v1325_v19 = vmul.f32 0.6931472, %v1732_v14 }
0x17af   :  { %v1339_v21 = vsub.f32 %v2106_v16, %v1327_v22 }
0x17b0   :  { %v1734_v23 = vpop.eup %1733  ;;  %v1338_v27 = vsub.f32 %v2108_v59, %v1325_v19 }
0x17b1   :  { %v1736_v28 = vpop.eup %1735  ;;  %1347 = vst.msk [vmem:[%s2169_s7 + $0x18] sm:$0xff] %vm1247_vm2, %v1339_v21  ;;  %v1331_v30 = vmul.f32 0.6931472, %v1734_v23 }
0x17b2   :  { %1346 = vst.msk [vmem:[%s2169_s7 + $0x10] sm:$0xff] %vm1247_vm2, %v1338_v27  ;;  %v1329_v32 = vmul.f32 0.6931472, %v1736_v28 }
0x17b3   :  { %v1341_v33 = vsub.f32 %v2112_v42, %v1331_v30 }
0x17b4   :  { %v1340_v24 = vsub.f32 %v2114_v43, %v1329_v32 }
0x17b5   :  { %1349 = vst.msk [vmem:[%s2169_s7 + $0x28] sm:$0xff] %vm1247_vm2, %v1341_v33 }
0x17b6   :  { %1348 = vst.msk [vmem:[%s2169_s7 + $0x20] sm:$0xff] %vm1247_vm2, %v1340_v24 }
0x1812   :  { %v1319_v25 = vpop.xlane.xlu1 %1318 }
0x1813   :  { %1737 = vlog2.f32 %v1319_v25  ;;  %v1316_v34 = vpop.xlane.xlu0 %1315 }
0x1814   :  { %1739 = vlog2.f32 %v1316_v34 }
0x181d   :  { %v1738_v17 = vpop.eup %1737 }
0x181e   :  { %v1740_v18 = vpop.eup %1739  ;;  %v1335_v35 = vmul.f32 0.6931472, %v1738_v17 }
0x181f   :  { %v1333_v36 = vmul.f32 0.6931472, %v1740_v18 }
0x1820   :  { %v1343_v2 = vsub.f32 %v1279_v53, %v1335_v35 }
0x1821   :  { %v1342_v4 = vsub.f32 %v1278_v31, %v1333_v36 }
0x1822   :  { %1351 = vst.msk [vmem:[%s2169_s7 + $0x38] sm:$0xff] %vm1247_vm2, %v1343_v2 }
0x1823   :  { %1350 = vst.msk [vmem:[%s2169_s7 + $0x30] sm:$0xff] %vm1247_vm2, %v1342_v4 }

</bundles_post_ra>
